<compile_context>
chip_gen: v7x
topology: tpu7x:2x2x1
jax: 0.10.0
libtpu: 0.0.40
codegen_flags: <defaults>
</compile_context>

<pallas_src>
import jax
import jax.numpy as jnp
from jax import lax
from jax.experimental import pallas as pl
from jax.experimental.pallas import tpu as pltpu

# ----------------------------- configuration --------------------------------
B = 8                                   # batch
N_CONT = 16                             # n_continuous_features
CAT_EMBED_DIMS = [(5, 8), (7, 8)]       # (cardinality, embedding_dim)
F = N_CONT + sum(d for _, d in CAT_EMBED_DIMS)   # n_features = 32
GFLU_STAGES = 2
NUM_TREES = 3
TREE_DEPTH = 2
OUT_DIM = 2 ** TREE_DEPTH               # 4 leaves per tree
N_HEADS = 2
RESIDUAL_SCALE = 0.05
N_STUMPS = 2 ** TREE_DEPTH - 1          # stumps per tree (1 + 2)
N_STUMPS_TOT = NUM_TREES * N_STUMPS     # 9
N_LAYERS_TOT = NUM_TREES * TREE_DEPTH   # 6 tree levels in total
P = 64                                  # padded feature width >= F + OUT_DIM*NUM_TREES (=44)
NEG_INF = -1e9                          # softmax padding -> exactly 0 weight


# ------------------------------- the kernel ---------------------------------
def gmfu_kernel(x_ref,
                wxz_ref, whz_ref, bz_ref,
                wxr_ref, whr_ref, br_ref,
                wor_ref, wox_ref, bo_ref,
                w0l_ref, cut_ref, w1s_ref,
                out_ref):
    f32 = jnp.float32
    x = x_ref[...]                                           # (B, P); cols >= F are 0
    h = x

    # ---------------- GFLU stages: 6 small (B,P)x(P,P) MXU dots per stage ----
    # Feature mask (mean over heads of softmax) is pre-folded into wxz/wxr rows.
    # Padded columns stay exactly 0 through every stage (zero weight rows/cols,
    # zero bias padding), so no masking is needed.
    for d in range(GFLU_STAGES):
        z = jax.nn.sigmoid(
            jnp.dot(x, wxz_ref[d], preferred_element_type=f32)
            + jnp.dot(h, whz_ref[d], preferred_element_type=f32)
            + bz_ref[d])
        r = jax.nn.sigmoid(
            jnp.dot(x, wxr_ref[d], preferred_element_type=f32)
            + jnp.dot(h, whr_ref[d], preferred_element_type=f32)
            + br_ref[d])
        h_new = jnp.tanh(
            jnp.dot(r * h, wor_ref[d], preferred_element_type=f32)
            + jnp.dot(x, wox_ref[d], preferred_element_type=f32)
            + bo_ref[d])
        h = (1.0 - z) * h + z * h_new + RESIDUAL_SCALE * x

    # ---------------- chained neural decision trees (register resident) ------
    # chain columns: [0, F) = GFLU output, [F + 4t, F + 4t + 4) = tree t output.
    # Stump weights are placement-folded (P, P) matrices, so inserting a level's
    # node outputs into the chained input is just an add of a dot result.
    chain = h
    level = 0
    stump = 0
    for t in range(NUM_TREES):
        xin = chain                                          # depth-0 input
        contrib = None
        for d in range(TREE_DEPTH):
            # bin-0 contribution for ALL stumps of this level (weights pre-summed)
            contrib = jnp.dot(jax.nn.sigmoid(xin), w0l_ref[level],
                              preferred_element_type=f32)
            # bin-1 contribution per stump (each stump has its own cut point)
            for _n in range(2 ** d):
                bins1 = jax.nn.sigmoid(2.0 * xin - cut_ref[stump])
                contrib = contrib + jnp.dot(bins1, w1s_ref[stump],
                                            preferred_element_type=f32)
                stump += 1
            level += 1
            if d < TREE_DEPTH - 1:
                # next level's input = chained features + this level's node outputs
                xin = chain + contrib
        # chain_trees=True: final level == tree output, lands at [F+4t, F+4t+4)
        chain = chain + contrib

    out_ref[...] = chain                                     # single coalesced store


# ------------------------------ host wrapper ---------------------------------
def _full_spec(shape):
    nd = len(shape)
    return pl.BlockSpec(shape, lambda i, _nd=nd: (0,) * _nd)


@jax.jit
def gmfu_backbone(x, kp):
    # pad input features to lane width P (cols >= F are exact zeros)
    x_pad = jnp.zeros((B, P), jnp.float32).at[:, :F].set(x)
    order = ["wxz", "whz", "bz", "wxr", "whr", "br", "wor", "wox", "bo",
             "w0l", "cut", "w1s"]
    inputs = [x_pad] + [kp[k] for k in order]
    chain = pl.pallas_call(
        gmfu_kernel,
        out_shape=jax.ShapeDtypeStruct((B, P), jnp.float32),
        grid=(1,),
        in_specs=[_full_spec(a.shape) for a in inputs],
        out_specs=_full_spec((B, P)),
        compiler_params=pltpu.CompilerParams(dimension_semantics=("arbitrary",)),
    )(*inputs)
    # tree t output sits at chain columns [F + 4t, F + 4t + 4)
    out_flat = chain[:, F:F + NUM_TREES * OUT_DIM]           # (B, NUM_TREES*OUT_DIM)
    # torch: cat([tree_out.unsqueeze(-1)], dim=-1) -> (B, 2**tree_depth, num_trees)
    return out_flat.reshape(B, NUM_TREES, OUT_DIM).transpose(0, 2, 1)


# ------------------------- deterministic parameters --------------------------
def init_params(key):
    """Original (module-style) parameters; used directly by the pure-JAX reference."""
    ks = iter(jax.random.split(key, 64))
    p = {}
    p["gfm"] = jax.random.normal(next(ks), (GFLU_STAGES, N_HEADS, F), jnp.float32)
    sc = 1.0 / jnp.sqrt(2.0 * F)
    for name in ["wfz", "whz", "wfr", "whr", "wor", "wox"]:
        p[name] = jax.random.uniform(next(ks), (GFLU_STAGES, F, F), jnp.float32, -sc, sc)
    for name in ["biz", "bir", "bo"]:
        p[name] = jax.random.uniform(next(ks), (GFLU_STAGES, 1, F), jnp.float32, -sc, sc)

    sfm = jnp.full((N_STUMPS_TOT, 1, P), NEG_INF, jnp.float32)
    scut = jnp.zeros((N_STUMPS_TOT, 1, P), jnp.float32)
    sl0 = jnp.zeros((N_STUMPS_TOT, 1, P), jnp.float32)
    sl1 = jnp.zeros((N_STUMPS_TOT, 1, P), jnp.float32)
    idx = 0
    for t in range(NUM_TREES):
        for d in range(TREE_DEPTH):
            # stump input width: chained features (+ previous level's nodes for d > 0)
            n_in = F + OUT_DIM * t + (2 ** d if d > 0 else 0)
            for _n in range(2 ** d):
                sfm = sfm.at[idx, 0, :n_in].set(jax.random.uniform(next(ks), (n_in,), jnp.float32))
                scut = scut.at[idx, 0, :n_in].set(jax.random.uniform(next(ks), (n_in,), jnp.float32))
                sl0 = sl0.at[idx, 0, :n_in].set(jax.random.uniform(next(ks), (n_in,), jnp.float32))
                sl1 = sl1.at[idx, 0, :n_in].set(jax.random.uniform(next(ks), (n_in,), jnp.float32))
                idx += 1
    p.update(sfm=sfm, scut=scut, sl0=sl0, sl1=sl1)
    return p


def pack_params(p):
    """One-time host-side constant folding of all eval-mode-static parameter math."""
    # --- GFLU: fold mask = mean_heads(softmax(gfm)) into x-side rows, pad to (P, P).
    mask = jnp.mean(jax.nn.softmax(p["gfm"], axis=-1), axis=1)            # (S, F)

    def pad_w(w):                                                          # (S,F,F)->(S,P,P)
        return jnp.zeros((GFLU_STAGES, P, P), jnp.float32).at[:, :F, :F].set(w)

    def pad_b(b):                                                          # (S,1,F)->(S,1,P)
        return jnp.zeros((GFLU_STAGES, 1, P), jnp.float32).at[:, :, :F].set(b)

    packed = dict(
        wxz=pad_w(mask[:, :, None] * p["wfz"]),
        whz=pad_w(p["whz"]),
        bz=pad_b(p["biz"]),
        wxr=pad_w(mask[:, :, None] * p["wfr"]),
        whr=pad_w(p["whr"]),
        br=pad_b(p["bir"]),
        wor=pad_w(p["wor"]),
        wox=pad_w(p["wox"]),
        bo=pad_b(p["bo"]),
    )

    # --- Stumps: fold softmax feature mask * leaf responses AND output-column
    #     placement into (P, P) dot matrices. bin-0 matrices of one tree level
    #     share their input activation, so pre-sum them into one per-level matrix.
    fm = jax.nn.softmax(p["sfm"], axis=-1)[:, 0, :]        # (NS, P); -1e9 pads -> exact 0
    w0_rows = fm * p["sl0"][:, 0, :]                       # (NS, P)
    w1_rows = fm * p["sl1"][:, 0, :]
    w0l = jnp.zeros((N_LAYERS_TOT, P, P), jnp.float32)     # per-level bin-0 matrices
    w1s = jnp.zeros((N_STUMPS_TOT, P, P), jnp.float32)     # per-stump bin-1 matrices
    idx = 0
    lvl = 0
    for t in range(NUM_TREES):
        base = F + OUT_DIM * t                             # tree t's output columns start here
        for d in range(TREE_DEPTH):
            for n in range(2 ** d):
                c0 = base + 2 * n                          # node n -> level cols (2n, 2n+1)
                c1 = base + 2 * n + 1
                w0l = w0l.at[lvl, :, c0].set(w0_rows[idx])
                w1s = w1s.at[idx, :, c1].set(w1_rows[idx])
                idx += 1
            lvl += 1
    packed.update(w0l=w0l, cut=p["scut"], w1s=w1s)
    return packed


# ------------------------- pure-JAX reference check --------------------------
def reference(x, p):
    dd = lambda a, b: jnp.dot(a, b, precision=lax.Precision.HIGHEST)
    h = x
    for d in range(GFLU_STAGES):
        mask = jnp.mean(jax.nn.softmax(p["gfm"][d], axis=-1), axis=0, keepdims=True)
        feat = mask * x
        z = jax.nn.sigmoid(dd(feat, p["wfz"][d]) + dd(h, p["whz"][d]) + p["biz"][d])
        r = jax.nn.sigmoid(dd(feat, p["wfr"][d]) + dd(h, p["whr"][d]) + p["bir"][d])
        h_out = jnp.tanh(dd(r * h, p["wor"][d]) + dd(x, p["wox"][d]) + p["bo"][d])
        h = (1.0 - z) * h + z * h_out + RESIDUAL_SCALE * x
    chain = h
    outs = []
    idx = 0
    for t in range(NUM_TREES):
        tree_x = chain
        tree_in = tree_x
        layer = None
        for d in range(TREE_DEPTH):
            nodes = []
            for _n in range(2 ** d):
                n_in = tree_in.shape[1]
                fm = jax.nn.softmax(p["sfm"][idx, 0, :n_in])
                cut = p["scut"][idx, 0, :n_in]
                l0 = p["sl0"][idx, 0, :n_in]
                l1 = p["sl1"][idx, 0, :n_in]
                o0 = jnp.sum(jax.nn.sigmoid(tree_in) * l0 * fm, axis=1, keepdims=True)
                o1 = jnp.sum(jax.nn.sigmoid(2.0 * tree_in - cut) * l1 * fm, axis=1, keepdims=True)
                nodes.append(jnp.concatenate([o0, o1], axis=1))
                idx += 1
            layer = jnp.concatenate(nodes, axis=1)
            tree_in = jnp.concatenate([tree_x, layer], axis=1)
        outs.append(layer[..., None])
        chain = jnp.concatenate([chain, layer], axis=1)
    return jnp.concatenate(outs, axis=-1)


if __name__ == "__main__":
    key = jax.random.PRNGKey(0)
    kx, kparam = jax.random.split(key)
    x = jax.random.normal(kx, (B, F), jnp.float32)
    params = init_params(kparam)
    packed = pack_params(params)

    out = jax.block_until_ready(gmfu_backbone(x, packed))
    assert out.shape == (B, OUT_DIM, NUM_TREES), out.shape

    ref = reference(x, params)
    max_err = float(jnp.max(jnp.abs(out - ref)))
    assert jnp.allclose(out, ref, atol=2e-2, rtol=2e-2), f"max_err={max_err}"

    print("KERNEL_OK")
</pallas_src>

<mosaic_0001>
module attributes {stable_mosaic.version = 11 : i64} {
  func.func @gmfu_kernel(%arg0: i32, %arg1: memref<8x64xf32, #tpu.memory_space<vmem>>, %arg2: memref<2x64x64xf32, #tpu.memory_space<vmem>>, %arg3: memref<2x64x64xf32, #tpu.memory_space<vmem>>, %arg4: memref<2x1x64xf32, #tpu.memory_space<vmem>>, %arg5: memref<2x64x64xf32, #tpu.memory_space<vmem>>, %arg6: memref<2x64x64xf32, #tpu.memory_space<vmem>>, %arg7: memref<2x1x64xf32, #tpu.memory_space<vmem>>, %arg8: memref<2x64x64xf32, #tpu.memory_space<vmem>>, %arg9: memref<2x64x64xf32, #tpu.memory_space<vmem>>, %arg10: memref<2x1x64xf32, #tpu.memory_space<vmem>>, %arg11: memref<6x64x64xf32, #tpu.memory_space<vmem>>, %arg12: memref<9x1x64xf32, #tpu.memory_space<vmem>>, %arg13: memref<9x64x64xf32, #tpu.memory_space<vmem>>, %arg14: memref<8x64xf32, #tpu.memory_space<vmem>>) attributes {dimension_semantics = [#tpu.dimension_semantics<arbitrary>], iteration_bounds = array<i64: 1>, scalar_prefetch = 0 : i64, scratch_operands = 0 : i64, tpu.core_type = #tpu.core_type<tc>, window_params = [{pipeline_mode = #tpu.pipeline_mode<synchronous>, transform_indices = @transform_0, window_bounds = array<i64: 8, 64>}, {pipeline_mode = #tpu.pipeline_mode<synchronous>, transform_indices = @transform_1, window_bounds = array<i64: 2, 64, 64>}, {pipeline_mode = #tpu.pipeline_mode<synchronous>, transform_indices = @transform_2, window_bounds = array<i64: 2, 64, 64>}, {pipeline_mode = #tpu.pipeline_mode<synchronous>, transform_indices = @transform_3, window_bounds = array<i64: 2, 1, 64>}, {pipeline_mode = #tpu.pipeline_mode<synchronous>, transform_indices = @transform_4, window_bounds = array<i64: 2, 64, 64>}, {pipeline_mode = #tpu.pipeline_mode<synchronous>, transform_indices = @transform_5, window_bounds = array<i64: 2, 64, 64>}, {pipeline_mode = #tpu.pipeline_mode<synchronous>, transform_indices = @transform_6, window_bounds = array<i64: 2, 1, 64>}, {pipeline_mode = #tpu.pipeline_mode<synchronous>, transform_indices = @transform_7, window_bounds = array<i64: 2, 64, 64>}, {pipeline_mode = #tpu.pipeline_mode<synchronous>, transform_indices = @transform_8, window_bounds = array<i64: 2, 64, 64>}, {pipeline_mode = #tpu.pipeline_mode<synchronous>, transform_indices = @transform_9, window_bounds = array<i64: 2, 1, 64>}, {pipeline_mode = #tpu.pipeline_mode<synchronous>, transform_indices = @transform_10, window_bounds = array<i64: 6, 64, 64>}, {pipeline_mode = #tpu.pipeline_mode<synchronous>, transform_indices = @transform_11, window_bounds = array<i64: 9, 1, 64>}, {pipeline_mode = #tpu.pipeline_mode<synchronous>, transform_indices = @transform_12, window_bounds = array<i64: 9, 64, 64>}, {pipeline_mode = #tpu.pipeline_mode<synchronous>, transform_indices = @transform_13, window_bounds = array<i64: 8, 64>}]} {
    %c0 = arith.constant 0 : index
    %c0_0 = arith.constant 0 : index
    %0 = vector.load %arg1[%c0, %c0_0] : memref<8x64xf32, #tpu.memory_space<vmem>>, vector<8x64xf32>
    %c0_1 = arith.constant 0 : index
    %c0_2 = arith.constant 0 : index
    %c0_3 = arith.constant 0 : index
    %1 = vector.load %arg2[%c0_1, %c0_2, %c0_3] : memref<2x64x64xf32, #tpu.memory_space<vmem>>, vector<1x64x64xf32>
    %2 = vector.shape_cast %1 : vector<1x64x64xf32> to vector<64x64xf32>
    %cst = arith.constant dense<0.000000e+00> : vector<8x64xf32>
    %3 = tpu.matmul %0, %2, %cst {dimension_numbers = #tpu.dot_dimension_numbers<[1], [0], [0], [1], [0, 0, 1, 1], [], []>} : vector<8x64xf32>, vector<64x64xf32>, vector<8x64xf32> -> vector<8x64xf32>
    %c0_4 = arith.constant 0 : index
    %c0_5 = arith.constant 0 : index
    %c0_6 = arith.constant 0 : index
    %4 = vector.load %arg3[%c0_4, %c0_5, %c0_6] : memref<2x64x64xf32, #tpu.memory_space<vmem>>, vector<1x64x64xf32>
    %5 = vector.shape_cast %4 : vector<1x64x64xf32> to vector<64x64xf32>
    %cst_7 = arith.constant dense<0.000000e+00> : vector<8x64xf32>
    %6 = tpu.matmul %0, %5, %cst_7 {dimension_numbers = #tpu.dot_dimension_numbers<[1], [0], [0], [1], [0, 0, 1, 1], [], []>} : vector<8x64xf32>, vector<64x64xf32>, vector<8x64xf32> -> vector<8x64xf32>
    %7 = arith.addf %3, %6 : vector<8x64xf32>
    %c0_8 = arith.constant 0 : index
    %c0_9 = arith.constant 0 : index
    %c0_10 = arith.constant 0 : index
    %8 = vector.load %arg4[%c0_8, %c0_9, %c0_10] : memref<2x1x64xf32, #tpu.memory_space<vmem>>, vector<1x1x64xf32>
    %9 = vector.shape_cast %8 : vector<1x1x64xf32> to vector<1x64xf32>
    %10 = vector.broadcast %9 : vector<1x64xf32> to vector<8x64xf32>
    %11 = arith.addf %7, %10 : vector<8x64xf32>
    %12 = arith.negf %11 : vector<8x64xf32>
    %13 = math.exp %12 : vector<8x64xf32>
    %cst_11 = arith.constant 1.000000e+00 : f32
    %14 = vector.broadcast %cst_11 : f32 to vector<8x64xf32>
    %15 = arith.addf %14, %13 : vector<8x64xf32>
    %16 = arith.divf %14, %15 : vector<8x64xf32>
    %c0_12 = arith.constant 0 : index
    %c0_13 = arith.constant 0 : index
    %c0_14 = arith.constant 0 : index
    %17 = vector.load %arg5[%c0_12, %c0_13, %c0_14] : memref<2x64x64xf32, #tpu.memory_space<vmem>>, vector<1x64x64xf32>
    %18 = vector.shape_cast %17 : vector<1x64x64xf32> to vector<64x64xf32>
    %cst_15 = arith.constant dense<0.000000e+00> : vector<8x64xf32>
    %19 = tpu.matmul %0, %18, %cst_15 {dimension_numbers = #tpu.dot_dimension_numbers<[1], [0], [0], [1], [0, 0, 1, 1], [], []>} : vector<8x64xf32>, vector<64x64xf32>, vector<8x64xf32> -> vector<8x64xf32>
    %c0_16 = arith.constant 0 : index
    %c0_17 = arith.constant 0 : index
    %c0_18 = arith.constant 0 : index
    %20 = vector.load %arg6[%c0_16, %c0_17, %c0_18] : memref<2x64x64xf32, #tpu.memory_space<vmem>>, vector<1x64x64xf32>
    %21 = vector.shape_cast %20 : vector<1x64x64xf32> to vector<64x64xf32>
    %cst_19 = arith.constant dense<0.000000e+00> : vector<8x64xf32>
    %22 = tpu.matmul %0, %21, %cst_19 {dimension_numbers = #tpu.dot_dimension_numbers<[1], [0], [0], [1], [0, 0, 1, 1], [], []>} : vector<8x64xf32>, vector<64x64xf32>, vector<8x64xf32> -> vector<8x64xf32>
    %23 = arith.addf %19, %22 : vector<8x64xf32>
    %c0_20 = arith.constant 0 : index
    %c0_21 = arith.constant 0 : index
    %c0_22 = arith.constant 0 : index
    %24 = vector.load %arg7[%c0_20, %c0_21, %c0_22] : memref<2x1x64xf32, #tpu.memory_space<vmem>>, vector<1x1x64xf32>
    %25 = vector.shape_cast %24 : vector<1x1x64xf32> to vector<1x64xf32>
    %26 = vector.broadcast %25 : vector<1x64xf32> to vector<8x64xf32>
    %27 = arith.addf %23, %26 : vector<8x64xf32>
    %28 = arith.negf %27 : vector<8x64xf32>
    %29 = math.exp %28 : vector<8x64xf32>
    %cst_23 = arith.constant 1.000000e+00 : f32
    %30 = vector.broadcast %cst_23 : f32 to vector<8x64xf32>
    %31 = arith.addf %30, %29 : vector<8x64xf32>
    %32 = arith.divf %30, %31 : vector<8x64xf32>
    %33 = arith.mulf %32, %0 : vector<8x64xf32>
    %c0_24 = arith.constant 0 : index
    %c0_25 = arith.constant 0 : index
    %c0_26 = arith.constant 0 : index
    %34 = vector.load %arg8[%c0_24, %c0_25, %c0_26] : memref<2x64x64xf32, #tpu.memory_space<vmem>>, vector<1x64x64xf32>
    %35 = vector.shape_cast %34 : vector<1x64x64xf32> to vector<64x64xf32>
    %cst_27 = arith.constant dense<0.000000e+00> : vector<8x64xf32>
    %36 = tpu.matmul %33, %35, %cst_27 {dimension_numbers = #tpu.dot_dimension_numbers<[1], [0], [0], [1], [0, 0, 1, 1], [], []>} : vector<8x64xf32>, vector<64x64xf32>, vector<8x64xf32> -> vector<8x64xf32>
    %c0_28 = arith.constant 0 : index
    %c0_29 = arith.constant 0 : index
    %c0_30 = arith.constant 0 : index
    %37 = vector.load %arg9[%c0_28, %c0_29, %c0_30] : memref<2x64x64xf32, #tpu.memory_space<vmem>>, vector<1x64x64xf32>
    %38 = vector.shape_cast %37 : vector<1x64x64xf32> to vector<64x64xf32>
    %cst_31 = arith.constant dense<0.000000e+00> : vector<8x64xf32>
    %39 = tpu.matmul %0, %38, %cst_31 {dimension_numbers = #tpu.dot_dimension_numbers<[1], [0], [0], [1], [0, 0, 1, 1], [], []>} : vector<8x64xf32>, vector<64x64xf32>, vector<8x64xf32> -> vector<8x64xf32>
    %40 = arith.addf %36, %39 : vector<8x64xf32>
    %c0_32 = arith.constant 0 : index
    %c0_33 = arith.constant 0 : index
    %c0_34 = arith.constant 0 : index
    %41 = vector.load %arg10[%c0_32, %c0_33, %c0_34] : memref<2x1x64xf32, #tpu.memory_space<vmem>>, vector<1x1x64xf32>
    %42 = vector.shape_cast %41 : vector<1x1x64xf32> to vector<1x64xf32>
    %43 = vector.broadcast %42 : vector<1x64xf32> to vector<8x64xf32>
    %44 = arith.addf %40, %43 : vector<8x64xf32>
    %45 = math.tanh %44 : vector<8x64xf32>
    %cst_35 = arith.constant 1.000000e+00 : f32
    %46 = vector.broadcast %cst_35 : f32 to vector<8x64xf32>
    %47 = arith.subf %46, %16 : vector<8x64xf32>
    %48 = arith.mulf %47, %0 : vector<8x64xf32>
    %49 = arith.mulf %16, %45 : vector<8x64xf32>
    %50 = arith.addf %48, %49 : vector<8x64xf32>
    %cst_36 = arith.constant 5.000000e-02 : f32
    %51 = vector.broadcast %cst_36 : f32 to vector<8x64xf32>
    %52 = arith.mulf %51, %0 : vector<8x64xf32>
    %53 = arith.addf %50, %52 : vector<8x64xf32>
    %c1 = arith.constant 1 : index
    %c0_37 = arith.constant 0 : index
    %c0_38 = arith.constant 0 : index
    %54 = vector.load %arg2[%c1, %c0_37, %c0_38] : memref<2x64x64xf32, #tpu.memory_space<vmem>>, vector<1x64x64xf32>
    %55 = vector.shape_cast %54 : vector<1x64x64xf32> to vector<64x64xf32>
    %cst_39 = arith.constant dense<0.000000e+00> : vector<8x64xf32>
    %56 = tpu.matmul %0, %55, %cst_39 {dimension_numbers = #tpu.dot_dimension_numbers<[1], [0], [0], [1], [0, 0, 1, 1], [], []>} : vector<8x64xf32>, vector<64x64xf32>, vector<8x64xf32> -> vector<8x64xf32>
    %c1_40 = arith.constant 1 : index
    %c0_41 = arith.constant 0 : index
    %c0_42 = arith.constant 0 : index
    %57 = vector.load %arg3[%c1_40, %c0_41, %c0_42] : memref<2x64x64xf32, #tpu.memory_space<vmem>>, vector<1x64x64xf32>
    %58 = vector.shape_cast %57 : vector<1x64x64xf32> to vector<64x64xf32>
    %cst_43 = arith.constant dense<0.000000e+00> : vector<8x64xf32>
    %59 = tpu.matmul %53, %58, %cst_43 {dimension_numbers = #tpu.dot_dimension_numbers<[1], [0], [0], [1], [0, 0, 1, 1], [], []>} : vector<8x64xf32>, vector<64x64xf32>, vector<8x64xf32> -> vector<8x64xf32>
    %60 = arith.addf %56, %59 : vector<8x64xf32>
    %c1_44 = arith.constant 1 : index
    %c0_45 = arith.constant 0 : index
    %c0_46 = arith.constant 0 : index
    %61 = vector.load %arg4[%c1_44, %c0_45, %c0_46] : memref<2x1x64xf32, #tpu.memory_space<vmem>>, vector<1x1x64xf32>
    %62 = vector.shape_cast %61 : vector<1x1x64xf32> to vector<1x64xf32>
    %63 = vector.broadcast %62 : vector<1x64xf32> to vector<8x64xf32>
    %64 = arith.addf %60, %63 : vector<8x64xf32>
    %65 = arith.negf %64 : vector<8x64xf32>
    %66 = math.exp %65 : vector<8x64xf32>
    %cst_47 = arith.constant 1.000000e+00 : f32
    %67 = vector.broadcast %cst_47 : f32 to vector<8x64xf32>
    %68 = arith.addf %67, %66 : vector<8x64xf32>
    %69 = arith.divf %67, %68 : vector<8x64xf32>
    %c1_48 = arith.constant 1 : index
    %c0_49 = arith.constant 0 : index
    %c0_50 = arith.constant 0 : index
    %70 = vector.load %arg5[%c1_48, %c0_49, %c0_50] : memref<2x64x64xf32, #tpu.memory_space<vmem>>, vector<1x64x64xf32>
    %71 = vector.shape_cast %70 : vector<1x64x64xf32> to vector<64x64xf32>
    %cst_51 = arith.constant dense<0.000000e+00> : vector<8x64xf32>
    %72 = tpu.matmul %0, %71, %cst_51 {dimension_numbers = #tpu.dot_dimension_numbers<[1], [0], [0], [1], [0, 0, 1, 1], [], []>} : vector<8x64xf32>, vector<64x64xf32>, vector<8x64xf32> -> vector<8x64xf32>
    %c1_52 = arith.constant 1 : index
    %c0_53 = arith.constant 0 : index
    %c0_54 = arith.constant 0 : index
    %73 = vector.load %arg6[%c1_52, %c0_53, %c0_54] : memref<2x64x64xf32, #tpu.memory_space<vmem>>, vector<1x64x64xf32>
    %74 = vector.shape_cast %73 : vector<1x64x64xf32> to vector<64x64xf32>
    %cst_55 = arith.constant dense<0.000000e+00> : vector<8x64xf32>
    %75 = tpu.matmul %53, %74, %cst_55 {dimension_numbers = #tpu.dot_dimension_numbers<[1], [0], [0], [1], [0, 0, 1, 1], [], []>} : vector<8x64xf32>, vector<64x64xf32>, vector<8x64xf32> -> vector<8x64xf32>
    %76 = arith.addf %72, %75 : vector<8x64xf32>
    %c1_56 = arith.constant 1 : index
    %c0_57 = arith.constant 0 : index
    %c0_58 = arith.constant 0 : index
    %77 = vector.load %arg7[%c1_56, %c0_57, %c0_58] : memref<2x1x64xf32, #tpu.memory_space<vmem>>, vector<1x1x64xf32>
    %78 = vector.shape_cast %77 : vector<1x1x64xf32> to vector<1x64xf32>
    %79 = vector.broadcast %78 : vector<1x64xf32> to vector<8x64xf32>
    %80 = arith.addf %76, %79 : vector<8x64xf32>
    %81 = arith.negf %80 : vector<8x64xf32>
    %82 = math.exp %81 : vector<8x64xf32>
    %cst_59 = arith.constant 1.000000e+00 : f32
    %83 = vector.broadcast %cst_59 : f32 to vector<8x64xf32>
    %84 = arith.addf %83, %82 : vector<8x64xf32>
    %85 = arith.divf %83, %84 : vector<8x64xf32>
    %86 = arith.mulf %85, %53 : vector<8x64xf32>
    %c1_60 = arith.constant 1 : index
    %c0_61 = arith.constant 0 : index
    %c0_62 = arith.constant 0 : index
    %87 = vector.load %arg8[%c1_60, %c0_61, %c0_62] : memref<2x64x64xf32, #tpu.memory_space<vmem>>, vector<1x64x64xf32>
    %88 = vector.shape_cast %87 : vector<1x64x64xf32> to vector<64x64xf32>
    %cst_63 = arith.constant dense<0.000000e+00> : vector<8x64xf32>
    %89 = tpu.matmul %86, %88, %cst_63 {dimension_numbers = #tpu.dot_dimension_numbers<[1], [0], [0], [1], [0, 0, 1, 1], [], []>} : vector<8x64xf32>, vector<64x64xf32>, vector<8x64xf32> -> vector<8x64xf32>
    %c1_64 = arith.constant 1 : index
    %c0_65 = arith.constant 0 : index
    %c0_66 = arith.constant 0 : index
    %90 = vector.load %arg9[%c1_64, %c0_65, %c0_66] : memref<2x64x64xf32, #tpu.memory_space<vmem>>, vector<1x64x64xf32>
    %91 = vector.shape_cast %90 : vector<1x64x64xf32> to vector<64x64xf32>
    %cst_67 = arith.constant dense<0.000000e+00> : vector<8x64xf32>
    %92 = tpu.matmul %0, %91, %cst_67 {dimension_numbers = #tpu.dot_dimension_numbers<[1], [0], [0], [1], [0, 0, 1, 1], [], []>} : vector<8x64xf32>, vector<64x64xf32>, vector<8x64xf32> -> vector<8x64xf32>
    %93 = arith.addf %89, %92 : vector<8x64xf32>
    %c1_68 = arith.constant 1 : index
    %c0_69 = arith.constant 0 : index
    %c0_70 = arith.constant 0 : index
    %94 = vector.load %arg10[%c1_68, %c0_69, %c0_70] : memref<2x1x64xf32, #tpu.memory_space<vmem>>, vector<1x1x64xf32>
    %95 = vector.shape_cast %94 : vector<1x1x64xf32> to vector<1x64xf32>
    %96 = vector.broadcast %95 : vector<1x64xf32> to vector<8x64xf32>
    %97 = arith.addf %93, %96 : vector<8x64xf32>
    %98 = math.tanh %97 : vector<8x64xf32>
    %cst_71 = arith.constant 1.000000e+00 : f32
    %99 = vector.broadcast %cst_71 : f32 to vector<8x64xf32>
    %100 = arith.subf %99, %69 : vector<8x64xf32>
    %101 = arith.mulf %100, %53 : vector<8x64xf32>
    %102 = arith.mulf %69, %98 : vector<8x64xf32>
    %103 = arith.addf %101, %102 : vector<8x64xf32>
    %cst_72 = arith.constant 5.000000e-02 : f32
    %104 = vector.broadcast %cst_72 : f32 to vector<8x64xf32>
    %105 = arith.mulf %104, %0 : vector<8x64xf32>
    %106 = arith.addf %103, %105 : vector<8x64xf32>
    %107 = arith.negf %106 : vector<8x64xf32>
    %108 = math.exp %107 : vector<8x64xf32>
    %cst_73 = arith.constant 1.000000e+00 : f32
    %109 = vector.broadcast %cst_73 : f32 to vector<8x64xf32>
    %110 = arith.addf %109, %108 : vector<8x64xf32>
    %111 = arith.divf %109, %110 : vector<8x64xf32>
    %c0_74 = arith.constant 0 : index
    %c0_75 = arith.constant 0 : index
    %c0_76 = arith.constant 0 : index
    %112 = vector.load %arg11[%c0_74, %c0_75, %c0_76] : memref<6x64x64xf32, #tpu.memory_space<vmem>>, vector<1x64x64xf32>
    %113 = vector.shape_cast %112 : vector<1x64x64xf32> to vector<64x64xf32>
    %cst_77 = arith.constant dense<0.000000e+00> : vector<8x64xf32>
    %114 = tpu.matmul %111, %113, %cst_77 {dimension_numbers = #tpu.dot_dimension_numbers<[1], [0], [0], [1], [0, 0, 1, 1], [], []>} : vector<8x64xf32>, vector<64x64xf32>, vector<8x64xf32> -> vector<8x64xf32>
    %cst_78 = arith.constant 2.000000e+00 : f32
    %115 = vector.broadcast %cst_78 : f32 to vector<8x64xf32>
    %116 = arith.mulf %115, %106 : vector<8x64xf32>
    %c0_79 = arith.constant 0 : index
    %c0_80 = arith.constant 0 : index
    %c0_81 = arith.constant 0 : index
    %117 = vector.load %arg12[%c0_79, %c0_80, %c0_81] : memref<9x1x64xf32, #tpu.memory_space<vmem>>, vector<1x1x64xf32>
    %118 = vector.shape_cast %117 : vector<1x1x64xf32> to vector<1x64xf32>
    %119 = vector.broadcast %118 : vector<1x64xf32> to vector<8x64xf32>
    %120 = arith.subf %116, %119 : vector<8x64xf32>
    %121 = arith.negf %120 : vector<8x64xf32>
    %122 = math.exp %121 : vector<8x64xf32>
    %cst_82 = arith.constant 1.000000e+00 : f32
    %123 = vector.broadcast %cst_82 : f32 to vector<8x64xf32>
    %124 = arith.addf %123, %122 : vector<8x64xf32>
    %125 = arith.divf %123, %124 : vector<8x64xf32>
    %c0_83 = arith.constant 0 : index
    %c0_84 = arith.constant 0 : index
    %c0_85 = arith.constant 0 : index
    %126 = vector.load %arg13[%c0_83, %c0_84, %c0_85] : memref<9x64x64xf32, #tpu.memory_space<vmem>>, vector<1x64x64xf32>
    %127 = vector.shape_cast %126 : vector<1x64x64xf32> to vector<64x64xf32>
    %cst_86 = arith.constant dense<0.000000e+00> : vector<8x64xf32>
    %128 = tpu.matmul %125, %127, %cst_86 {dimension_numbers = #tpu.dot_dimension_numbers<[1], [0], [0], [1], [0, 0, 1, 1], [], []>} : vector<8x64xf32>, vector<64x64xf32>, vector<8x64xf32> -> vector<8x64xf32>
    %129 = arith.addf %114, %128 : vector<8x64xf32>
    %130 = arith.addf %106, %129 : vector<8x64xf32>
    %131 = arith.negf %130 : vector<8x64xf32>
    %132 = math.exp %131 : vector<8x64xf32>
    %cst_87 = arith.constant 1.000000e+00 : f32
    %133 = vector.broadcast %cst_87 : f32 to vector<8x64xf32>
    %134 = arith.addf %133, %132 : vector<8x64xf32>
    %135 = arith.divf %133, %134 : vector<8x64xf32>
    %c1_88 = arith.constant 1 : index
    %c0_89 = arith.constant 0 : index
    %c0_90 = arith.constant 0 : index
    %136 = vector.load %arg11[%c1_88, %c0_89, %c0_90] : memref<6x64x64xf32, #tpu.memory_space<vmem>>, vector<1x64x64xf32>
    %137 = vector.shape_cast %136 : vector<1x64x64xf32> to vector<64x64xf32>
    %cst_91 = arith.constant dense<0.000000e+00> : vector<8x64xf32>
    %138 = tpu.matmul %135, %137, %cst_91 {dimension_numbers = #tpu.dot_dimension_numbers<[1], [0], [0], [1], [0, 0, 1, 1], [], []>} : vector<8x64xf32>, vector<64x64xf32>, vector<8x64xf32> -> vector<8x64xf32>
    %cst_92 = arith.constant 2.000000e+00 : f32
    %139 = vector.broadcast %cst_92 : f32 to vector<8x64xf32>
    %140 = arith.mulf %139, %130 : vector<8x64xf32>
    %c1_93 = arith.constant 1 : index
    %c0_94 = arith.constant 0 : index
    %c0_95 = arith.constant 0 : index
    %141 = vector.load %arg12[%c1_93, %c0_94, %c0_95] : memref<9x1x64xf32, #tpu.memory_space<vmem>>, vector<1x1x64xf32>
    %142 = vector.shape_cast %141 : vector<1x1x64xf32> to vector<1x64xf32>
    %143 = vector.broadcast %142 : vector<1x64xf32> to vector<8x64xf32>
    %144 = arith.subf %140, %143 : vector<8x64xf32>
    %145 = arith.negf %144 : vector<8x64xf32>
    %146 = math.exp %145 : vector<8x64xf32>
    %cst_96 = arith.constant 1.000000e+00 : f32
    %147 = vector.broadcast %cst_96 : f32 to vector<8x64xf32>
    %148 = arith.addf %147, %146 : vector<8x64xf32>
    %149 = arith.divf %147, %148 : vector<8x64xf32>
    %c1_97 = arith.constant 1 : index
    %c0_98 = arith.constant 0 : index
    %c0_99 = arith.constant 0 : index
    %150 = vector.load %arg13[%c1_97, %c0_98, %c0_99] : memref<9x64x64xf32, #tpu.memory_space<vmem>>, vector<1x64x64xf32>
    %151 = vector.shape_cast %150 : vector<1x64x64xf32> to vector<64x64xf32>
    %cst_100 = arith.constant dense<0.000000e+00> : vector<8x64xf32>
    %152 = tpu.matmul %149, %151, %cst_100 {dimension_numbers = #tpu.dot_dimension_numbers<[1], [0], [0], [1], [0, 0, 1, 1], [], []>} : vector<8x64xf32>, vector<64x64xf32>, vector<8x64xf32> -> vector<8x64xf32>
    %153 = arith.addf %138, %152 : vector<8x64xf32>
    %cst_101 = arith.constant 2.000000e+00 : f32
    %154 = vector.broadcast %cst_101 : f32 to vector<8x64xf32>
    %155 = arith.mulf %154, %130 : vector<8x64xf32>
    %c2 = arith.constant 2 : index
    %c0_102 = arith.constant 0 : index
    %c0_103 = arith.constant 0 : index
    %156 = vector.load %arg12[%c2, %c0_102, %c0_103] : memref<9x1x64xf32, #tpu.memory_space<vmem>>, vector<1x1x64xf32>
    %157 = vector.shape_cast %156 : vector<1x1x64xf32> to vector<1x64xf32>
    %158 = vector.broadcast %157 : vector<1x64xf32> to vector<8x64xf32>
    %159 = arith.subf %155, %158 : vector<8x64xf32>
    %160 = arith.negf %159 : vector<8x64xf32>
    %161 = math.exp %160 : vector<8x64xf32>
    %cst_104 = arith.constant 1.000000e+00 : f32
    %162 = vector.broadcast %cst_104 : f32 to vector<8x64xf32>
    %163 = arith.addf %162, %161 : vector<8x64xf32>
    %164 = arith.divf %162, %163 : vector<8x64xf32>
    %c2_105 = arith.constant 2 : index
    %c0_106 = arith.constant 0 : index
    %c0_107 = arith.constant 0 : index
    %165 = vector.load %arg13[%c2_105, %c0_106, %c0_107] : memref<9x64x64xf32, #tpu.memory_space<vmem>>, vector<1x64x64xf32>
    %166 = vector.shape_cast %165 : vector<1x64x64xf32> to vector<64x64xf32>
    %cst_108 = arith.constant dense<0.000000e+00> : vector<8x64xf32>
    %167 = tpu.matmul %164, %166, %cst_108 {dimension_numbers = #tpu.dot_dimension_numbers<[1], [0], [0], [1], [0, 0, 1, 1], [], []>} : vector<8x64xf32>, vector<64x64xf32>, vector<8x64xf32> -> vector<8x64xf32>
    %168 = arith.addf %153, %167 : vector<8x64xf32>
    %169 = arith.addf %106, %168 : vector<8x64xf32>
    %170 = arith.negf %169 : vector<8x64xf32>
    %171 = math.exp %170 : vector<8x64xf32>
    %cst_109 = arith.constant 1.000000e+00 : f32
    %172 = vector.broadcast %cst_109 : f32 to vector<8x64xf32>
    %173 = arith.addf %172, %171 : vector<8x64xf32>
    %174 = arith.divf %172, %173 : vector<8x64xf32>
    %c2_110 = arith.constant 2 : index
    %c0_111 = arith.constant 0 : index
    %c0_112 = arith.constant 0 : index
    %175 = vector.load %arg11[%c2_110, %c0_111, %c0_112] : memref<6x64x64xf32, #tpu.memory_space<vmem>>, vector<1x64x64xf32>
    %176 = vector.shape_cast %175 : vector<1x64x64xf32> to vector<64x64xf32>
    %cst_113 = arith.constant dense<0.000000e+00> : vector<8x64xf32>
    %177 = tpu.matmul %174, %176, %cst_113 {dimension_numbers = #tpu.dot_dimension_numbers<[1], [0], [0], [1], [0, 0, 1, 1], [], []>} : vector<8x64xf32>, vector<64x64xf32>, vector<8x64xf32> -> vector<8x64xf32>
    %cst_114 = arith.constant 2.000000e+00 : f32
    %178 = vector.broadcast %cst_114 : f32 to vector<8x64xf32>
    %179 = arith.mulf %178, %169 : vector<8x64xf32>
    %c3 = arith.constant 3 : index
    %c0_115 = arith.constant 0 : index
    %c0_116 = arith.constant 0 : index
    %180 = vector.load %arg12[%c3, %c0_115, %c0_116] : memref<9x1x64xf32, #tpu.memory_space<vmem>>, vector<1x1x64xf32>
    %181 = vector.shape_cast %180 : vector<1x1x64xf32> to vector<1x64xf32>
    %182 = vector.broadcast %181 : vector<1x64xf32> to vector<8x64xf32>
    %183 = arith.subf %179, %182 : vector<8x64xf32>
    %184 = arith.negf %183 : vector<8x64xf32>
    %185 = math.exp %184 : vector<8x64xf32>
    %cst_117 = arith.constant 1.000000e+00 : f32
    %186 = vector.broadcast %cst_117 : f32 to vector<8x64xf32>
    %187 = arith.addf %186, %185 : vector<8x64xf32>
    %188 = arith.divf %186, %187 : vector<8x64xf32>
    %c3_118 = arith.constant 3 : index
    %c0_119 = arith.constant 0 : index
    %c0_120 = arith.constant 0 : index
    %189 = vector.load %arg13[%c3_118, %c0_119, %c0_120] : memref<9x64x64xf32, #tpu.memory_space<vmem>>, vector<1x64x64xf32>
    %190 = vector.shape_cast %189 : vector<1x64x64xf32> to vector<64x64xf32>
    %cst_121 = arith.constant dense<0.000000e+00> : vector<8x64xf32>
    %191 = tpu.matmul %188, %190, %cst_121 {dimension_numbers = #tpu.dot_dimension_numbers<[1], [0], [0], [1], [0, 0, 1, 1], [], []>} : vector<8x64xf32>, vector<64x64xf32>, vector<8x64xf32> -> vector<8x64xf32>
    %192 = arith.addf %177, %191 : vector<8x64xf32>
    %193 = arith.addf %169, %192 : vector<8x64xf32>
    %194 = arith.negf %193 : vector<8x64xf32>
    %195 = math.exp %194 : vector<8x64xf32>
    %cst_122 = arith.constant 1.000000e+00 : f32
    %196 = vector.broadcast %cst_122 : f32 to vector<8x64xf32>
    %197 = arith.addf %196, %195 : vector<8x64xf32>
    %198 = arith.divf %196, %197 : vector<8x64xf32>
    %c3_123 = arith.constant 3 : index
    %c0_124 = arith.constant 0 : index
    %c0_125 = arith.constant 0 : index
    %199 = vector.load %arg11[%c3_123, %c0_124, %c0_125] : memref<6x64x64xf32, #tpu.memory_space<vmem>>, vector<1x64x64xf32>
    %200 = vector.shape_cast %199 : vector<1x64x64xf32> to vector<64x64xf32>
    %cst_126 = arith.constant dense<0.000000e+00> : vector<8x64xf32>
    %201 = tpu.matmul %198, %200, %cst_126 {dimension_numbers = #tpu.dot_dimension_numbers<[1], [0], [0], [1], [0, 0, 1, 1], [], []>} : vector<8x64xf32>, vector<64x64xf32>, vector<8x64xf32> -> vector<8x64xf32>
    %cst_127 = arith.constant 2.000000e+00 : f32
    %202 = vector.broadcast %cst_127 : f32 to vector<8x64xf32>
    %203 = arith.mulf %202, %193 : vector<8x64xf32>
    %c4 = arith.constant 4 : index
    %c0_128 = arith.constant 0 : index
    %c0_129 = arith.constant 0 : index
    %204 = vector.load %arg12[%c4, %c0_128, %c0_129] : memref<9x1x64xf32, #tpu.memory_space<vmem>>, vector<1x1x64xf32>
    %205 = vector.shape_cast %204 : vector<1x1x64xf32> to vector<1x64xf32>
    %206 = vector.broadcast %205 : vector<1x64xf32> to vector<8x64xf32>
    %207 = arith.subf %203, %206 : vector<8x64xf32>
    %208 = arith.negf %207 : vector<8x64xf32>
    %209 = math.exp %208 : vector<8x64xf32>
    %cst_130 = arith.constant 1.000000e+00 : f32
    %210 = vector.broadcast %cst_130 : f32 to vector<8x64xf32>
    %211 = arith.addf %210, %209 : vector<8x64xf32>
    %212 = arith.divf %210, %211 : vector<8x64xf32>
    %c4_131 = arith.constant 4 : index
    %c0_132 = arith.constant 0 : index
    %c0_133 = arith.constant 0 : index
    %213 = vector.load %arg13[%c4_131, %c0_132, %c0_133] : memref<9x64x64xf32, #tpu.memory_space<vmem>>, vector<1x64x64xf32>
    %214 = vector.shape_cast %213 : vector<1x64x64xf32> to vector<64x64xf32>
    %cst_134 = arith.constant dense<0.000000e+00> : vector<8x64xf32>
    %215 = tpu.matmul %212, %214, %cst_134 {dimension_numbers = #tpu.dot_dimension_numbers<[1], [0], [0], [1], [0, 0, 1, 1], [], []>} : vector<8x64xf32>, vector<64x64xf32>, vector<8x64xf32> -> vector<8x64xf32>
    %216 = arith.addf %201, %215 : vector<8x64xf32>
    %cst_135 = arith.constant 2.000000e+00 : f32
    %217 = vector.broadcast %cst_135 : f32 to vector<8x64xf32>
    %218 = arith.mulf %217, %193 : vector<8x64xf32>
    %c5 = arith.constant 5 : index
    %c0_136 = arith.constant 0 : index
    %c0_137 = arith.constant 0 : index
    %219 = vector.load %arg12[%c5, %c0_136, %c0_137] : memref<9x1x64xf32, #tpu.memory_space<vmem>>, vector<1x1x64xf32>
    %220 = vector.shape_cast %219 : vector<1x1x64xf32> to vector<1x64xf32>
    %221 = vector.broadcast %220 : vector<1x64xf32> to vector<8x64xf32>
    %222 = arith.subf %218, %221 : vector<8x64xf32>
    %223 = arith.negf %222 : vector<8x64xf32>
    %224 = math.exp %223 : vector<8x64xf32>
    %cst_138 = arith.constant 1.000000e+00 : f32
    %225 = vector.broadcast %cst_138 : f32 to vector<8x64xf32>
    %226 = arith.addf %225, %224 : vector<8x64xf32>
    %227 = arith.divf %225, %226 : vector<8x64xf32>
    %c5_139 = arith.constant 5 : index
    %c0_140 = arith.constant 0 : index
    %c0_141 = arith.constant 0 : index
    %228 = vector.load %arg13[%c5_139, %c0_140, %c0_141] : memref<9x64x64xf32, #tpu.memory_space<vmem>>, vector<1x64x64xf32>
    %229 = vector.shape_cast %228 : vector<1x64x64xf32> to vector<64x64xf32>
    %cst_142 = arith.constant dense<0.000000e+00> : vector<8x64xf32>
    %230 = tpu.matmul %227, %229, %cst_142 {dimension_numbers = #tpu.dot_dimension_numbers<[1], [0], [0], [1], [0, 0, 1, 1], [], []>} : vector<8x64xf32>, vector<64x64xf32>, vector<8x64xf32> -> vector<8x64xf32>
    %231 = arith.addf %216, %230 : vector<8x64xf32>
    %232 = arith.addf %169, %231 : vector<8x64xf32>
    %233 = arith.negf %232 : vector<8x64xf32>
    %234 = math.exp %233 : vector<8x64xf32>
    %cst_143 = arith.constant 1.000000e+00 : f32
    %235 = vector.broadcast %cst_143 : f32 to vector<8x64xf32>
    %236 = arith.addf %235, %234 : vector<8x64xf32>
    %237 = arith.divf %235, %236 : vector<8x64xf32>
    %c4_144 = arith.constant 4 : index
    %c0_145 = arith.constant 0 : index
    %c0_146 = arith.constant 0 : index
    %238 = vector.load %arg11[%c4_144, %c0_145, %c0_146] : memref<6x64x64xf32, #tpu.memory_space<vmem>>, vector<1x64x64xf32>
    %239 = vector.shape_cast %238 : vector<1x64x64xf32> to vector<64x64xf32>
    %cst_147 = arith.constant dense<0.000000e+00> : vector<8x64xf32>
    %240 = tpu.matmul %237, %239, %cst_147 {dimension_numbers = #tpu.dot_dimension_numbers<[1], [0], [0], [1], [0, 0, 1, 1], [], []>} : vector<8x64xf32>, vector<64x64xf32>, vector<8x64xf32> -> vector<8x64xf32>
    %cst_148 = arith.constant 2.000000e+00 : f32
    %241 = vector.broadcast %cst_148 : f32 to vector<8x64xf32>
    %242 = arith.mulf %241, %232 : vector<8x64xf32>
    %c6 = arith.constant 6 : index
    %c0_149 = arith.constant 0 : index
    %c0_150 = arith.constant 0 : index
    %243 = vector.load %arg12[%c6, %c0_149, %c0_150] : memref<9x1x64xf32, #tpu.memory_space<vmem>>, vector<1x1x64xf32>
    %244 = vector.shape_cast %243 : vector<1x1x64xf32> to vector<1x64xf32>
    %245 = vector.broadcast %244 : vector<1x64xf32> to vector<8x64xf32>
    %246 = arith.subf %242, %245 : vector<8x64xf32>
    %247 = arith.negf %246 : vector<8x64xf32>
    %248 = math.exp %247 : vector<8x64xf32>
    %cst_151 = arith.constant 1.000000e+00 : f32
    %249 = vector.broadcast %cst_151 : f32 to vector<8x64xf32>
    %250 = arith.addf %249, %248 : vector<8x64xf32>
    %251 = arith.divf %249, %250 : vector<8x64xf32>
    %c6_152 = arith.constant 6 : index
    %c0_153 = arith.constant 0 : index
    %c0_154 = arith.constant 0 : index
    %252 = vector.load %arg13[%c6_152, %c0_153, %c0_154] : memref<9x64x64xf32, #tpu.memory_space<vmem>>, vector<1x64x64xf32>
    %253 = vector.shape_cast %252 : vector<1x64x64xf32> to vector<64x64xf32>
    %cst_155 = arith.constant dense<0.000000e+00> : vector<8x64xf32>
    %254 = tpu.matmul %251, %253, %cst_155 {dimension_numbers = #tpu.dot_dimension_numbers<[1], [0], [0], [1], [0, 0, 1, 1], [], []>} : vector<8x64xf32>, vector<64x64xf32>, vector<8x64xf32> -> vector<8x64xf32>
    %255 = arith.addf %240, %254 : vector<8x64xf32>
    %256 = arith.addf %232, %255 : vector<8x64xf32>
    %257 = arith.negf %256 : vector<8x64xf32>
    %258 = math.exp %257 : vector<8x64xf32>
    %cst_156 = arith.constant 1.000000e+00 : f32
    %259 = vector.broadcast %cst_156 : f32 to vector<8x64xf32>
    %260 = arith.addf %259, %258 : vector<8x64xf32>
    %261 = arith.divf %259, %260 : vector<8x64xf32>
    %c5_157 = arith.constant 5 : index
    %c0_158 = arith.constant 0 : index
    %c0_159 = arith.constant 0 : index
    %262 = vector.load %arg11[%c5_157, %c0_158, %c0_159] : memref<6x64x64xf32, #tpu.memory_space<vmem>>, vector<1x64x64xf32>
    %263 = vector.shape_cast %262 : vector<1x64x64xf32> to vector<64x64xf32>
    %cst_160 = arith.constant dense<0.000000e+00> : vector<8x64xf32>
    %264 = tpu.matmul %261, %263, %cst_160 {dimension_numbers = #tpu.dot_dimension_numbers<[1], [0], [0], [1], [0, 0, 1, 1], [], []>} : vector<8x64xf32>, vector<64x64xf32>, vector<8x64xf32> -> vector<8x64xf32>
    %cst_161 = arith.constant 2.000000e+00 : f32
    %265 = vector.broadcast %cst_161 : f32 to vector<8x64xf32>
    %266 = arith.mulf %265, %256 : vector<8x64xf32>
    %c7 = arith.constant 7 : index
    %c0_162 = arith.constant 0 : index
    %c0_163 = arith.constant 0 : index
    %267 = vector.load %arg12[%c7, %c0_162, %c0_163] : memref<9x1x64xf32, #tpu.memory_space<vmem>>, vector<1x1x64xf32>
    %268 = vector.shape_cast %267 : vector<1x1x64xf32> to vector<1x64xf32>
    %269 = vector.broadcast %268 : vector<1x64xf32> to vector<8x64xf32>
    %270 = arith.subf %266, %269 : vector<8x64xf32>
    %271 = arith.negf %270 : vector<8x64xf32>
    %272 = math.exp %271 : vector<8x64xf32>
    %cst_164 = arith.constant 1.000000e+00 : f32
    %273 = vector.broadcast %cst_164 : f32 to vector<8x64xf32>
    %274 = arith.addf %273, %272 : vector<8x64xf32>
    %275 = arith.divf %273, %274 : vector<8x64xf32>
    %c7_165 = arith.constant 7 : index
    %c0_166 = arith.constant 0 : index
    %c0_167 = arith.constant 0 : index
    %276 = vector.load %arg13[%c7_165, %c0_166, %c0_167] : memref<9x64x64xf32, #tpu.memory_space<vmem>>, vector<1x64x64xf32>
    %277 = vector.shape_cast %276 : vector<1x64x64xf32> to vector<64x64xf32>
    %cst_168 = arith.constant dense<0.000000e+00> : vector<8x64xf32>
    %278 = tpu.matmul %275, %277, %cst_168 {dimension_numbers = #tpu.dot_dimension_numbers<[1], [0], [0], [1], [0, 0, 1, 1], [], []>} : vector<8x64xf32>, vector<64x64xf32>, vector<8x64xf32> -> vector<8x64xf32>
    %279 = arith.addf %264, %278 : vector<8x64xf32>
    %cst_169 = arith.constant 2.000000e+00 : f32
    %280 = vector.broadcast %cst_169 : f32 to vector<8x64xf32>
    %281 = arith.mulf %280, %256 : vector<8x64xf32>
    %c8 = arith.constant 8 : index
    %c0_170 = arith.constant 0 : index
    %c0_171 = arith.constant 0 : index
    %282 = vector.load %arg12[%c8, %c0_170, %c0_171] : memref<9x1x64xf32, #tpu.memory_space<vmem>>, vector<1x1x64xf32>
    %283 = vector.shape_cast %282 : vector<1x1x64xf32> to vector<1x64xf32>
    %284 = vector.broadcast %283 : vector<1x64xf32> to vector<8x64xf32>
    %285 = arith.subf %281, %284 : vector<8x64xf32>
    %286 = arith.negf %285 : vector<8x64xf32>
    %287 = math.exp %286 : vector<8x64xf32>
    %cst_172 = arith.constant 1.000000e+00 : f32
    %288 = vector.broadcast %cst_172 : f32 to vector<8x64xf32>
    %289 = arith.addf %288, %287 : vector<8x64xf32>
    %290 = arith.divf %288, %289 : vector<8x64xf32>
    %c8_173 = arith.constant 8 : index
    %c0_174 = arith.constant 0 : index
    %c0_175 = arith.constant 0 : index
    %291 = vector.load %arg13[%c8_173, %c0_174, %c0_175] : memref<9x64x64xf32, #tpu.memory_space<vmem>>, vector<1x64x64xf32>
    %292 = vector.shape_cast %291 : vector<1x64x64xf32> to vector<64x64xf32>
    %cst_176 = arith.constant dense<0.000000e+00> : vector<8x64xf32>
    %293 = tpu.matmul %290, %292, %cst_176 {dimension_numbers = #tpu.dot_dimension_numbers<[1], [0], [0], [1], [0, 0, 1, 1], [], []>} : vector<8x64xf32>, vector<64x64xf32>, vector<8x64xf32> -> vector<8x64xf32>
    %294 = arith.addf %279, %293 : vector<8x64xf32>
    %295 = arith.addf %232, %294 : vector<8x64xf32>
    %c0_177 = arith.constant 0 : index
    %c0_178 = arith.constant 0 : index
    %296 = vector.load %arg14[%c0_177, %c0_178] : memref<8x64xf32, #tpu.memory_space<vmem>>, vector<8x64xf32>
    tpu.vector_store %arg14[%c0_177, %c0_178], %295 {strides = array<i32>} : memref<8x64xf32, #tpu.memory_space<vmem>>, vector<8x64xf32>,
    return
  }
  func.func @transform_0(%arg0: i32) -> (i32, i32) {
    %c0_i32 = arith.constant 0 : i32
    %c0_i32_0 = arith.constant 0 : i32
    %c0_i32_1 = arith.constant 0 : i32
    return %c0_i32, %c0_i32_0 : i32, i32
  }
  func.func @transform_1(%arg0: i32) -> (i32, i32, i32) {
    %c0_i32 = arith.constant 0 : i32
    %c0_i32_0 = arith.constant 0 : i32
    %c0_i32_1 = arith.constant 0 : i32
    %c0_i32_2 = arith.constant 0 : i32
    return %c0_i32, %c0_i32_0, %c0_i32_1 : i32, i32, i32
  }
  func.func @transform_2(%arg0: i32) -> (i32, i32, i32) {
    %c0_i32 = arith.constant 0 : i32
    %c0_i32_0 = arith.constant 0 : i32
    %c0_i32_1 = arith.constant 0 : i32
    %c0_i32_2 = arith.constant 0 : i32
    return %c0_i32, %c0_i32_0, %c0_i32_1 : i32, i32, i32
  }
  func.func @transform_3(%arg0: i32) -> (i32, i32, i32) {
    %c0_i32 = arith.constant 0 : i32
    %c0_i32_0 = arith.constant 0 : i32
    %c0_i32_1 = arith.constant 0 : i32
    %c0_i32_2 = arith.constant 0 : i32
    return %c0_i32, %c0_i32_0, %c0_i32_1 : i32, i32, i32
  }
  func.func @transform_4(%arg0: i32) -> (i32, i32, i32) {
    %c0_i32 = arith.constant 0 : i32
    %c0_i32_0 = arith.constant 0 : i32
    %c0_i32_1 = arith.constant 0 : i32
    %c0_i32_2 = arith.constant 0 : i32
    return %c0_i32, %c0_i32_0, %c0_i32_1 : i32, i32, i32
  }
  func.func @transform_5(%arg0: i32) -> (i32, i32, i32) {
    %c0_i32 = arith.constant 0 : i32
    %c0_i32_0 = arith.constant 0 : i32
    %c0_i32_1 = arith.constant 0 : i32
    %c0_i32_2 = arith.constant 0 : i32
    return %c0_i32, %c0_i32_0, %c0_i32_1 : i32, i32, i32
  }
  func.func @transform_6(%arg0: i32) -> (i32, i32, i32) {
    %c0_i32 = arith.constant 0 : i32
    %c0_i32_0 = arith.constant 0 : i32
    %c0_i32_1 = arith.constant 0 : i32
    %c0_i32_2 = arith.constant 0 : i32
    return %c0_i32, %c0_i32_0, %c0_i32_1 : i32, i32, i32
  }
  func.func @transform_7(%arg0: i32) -> (i32, i32, i32) {
    %c0_i32 = arith.constant 0 : i32
    %c0_i32_0 = arith.constant 0 : i32
    %c0_i32_1 = arith.constant 0 : i32
    %c0_i32_2 = arith.constant 0 : i32
    return %c0_i32, %c0_i32_0, %c0_i32_1 : i32, i32, i32
  }
  func.func @transform_8(%arg0: i32) -> (i32, i32, i32) {
    %c0_i32 = arith.constant 0 : i32
    %c0_i32_0 = arith.constant 0 : i32
    %c0_i32_1 = arith.constant 0 : i32
    %c0_i32_2 = arith.constant 0 : i32
    return %c0_i32, %c0_i32_0, %c0_i32_1 : i32, i32, i32
  }
  func.func @transform_9(%arg0: i32) -> (i32, i32, i32) {
    %c0_i32 = arith.constant 0 : i32
    %c0_i32_0 = arith.constant 0 : i32
    %c0_i32_1 = arith.constant 0 : i32
    %c0_i32_2 = arith.constant 0 : i32
    return %c0_i32, %c0_i32_0, %c0_i32_1 : i32, i32, i32
  }
  func.func @transform_10(%arg0: i32) -> (i32, i32, i32) {
    %c0_i32 = arith.constant 0 : i32
    %c0_i32_0 = arith.constant 0 : i32
    %c0_i32_1 = arith.constant 0 : i32
    %c0_i32_2 = arith.constant 0 : i32
    return %c0_i32, %c0_i32_0, %c0_i32_1 : i32, i32, i32
  }
  func.func @transform_11(%arg0: i32) -> (i32, i32, i32) {
    %c0_i32 = arith.constant 0 : i32
    %c0_i32_0 = arith.constant 0 : i32
    %c0_i32_1 = arith.constant 0 : i32
    %c0_i32_2 = arith.constant 0 : i32
    return %c0_i32, %c0_i32_0, %c0_i32_1 : i32, i32, i32
  }
  func.func @transform_12(%arg0: i32) -> (i32, i32, i32) {
    %c0_i32 = arith.constant 0 : i32
    %c0_i32_0 = arith.constant 0 : i32
    %c0_i32_1 = arith.constant 0 : i32
    %c0_i32_2 = arith.constant 0 : i32
    return %c0_i32, %c0_i32_0, %c0_i32_1 : i32, i32, i32
  }
  func.func @transform_13(%arg0: i32) -> (i32, i32) {
    %c0_i32 = arith.constant 0 : i32
    %c0_i32_0 = arith.constant 0 : i32
    %c0_i32_1 = arith.constant 0 : i32
    return %c0_i32, %c0_i32_0 : i32, i32
  }
}

</mosaic_0001>

<bundles_post_ra>
// kernel: gmfu_backbone.1
= control target key start
LH: loop header
LB: loop body
LE: loop exit
PB: predicated region body
PF: predicated region fallthrough
CT: control target
= control target key end

     0   :  { %18 = vsyncpa [#allocation3], 0  ;;  %s4572_s0 = inlined_call_operand.vmem [shape: f32[8,64], index: 0, kind: input, shape index: {}]   ;;  %s4573_s1 = inlined_call_operand.hbm [shape: f32[2,64,64], index: 1, kind: input, shape index: {}]   ;;  %s4574_s2 = inlined_call_operand.hbm [shape: f32[2,64,64], index: 2, kind: input, shape index: {}]   ;;  %s4575_s3 = inlined_call_operand.vmem [shape: f32[2,1,64], index: 3, kind: input, shape index: {}]   ;;  %s4576_s4 = inlined_call_operand.hbm [shape: f32[2,64,64], index: 4, kind: input, shape index: {}]   ;;  %s4577_s5 = inlined_call_operand.hbm [shape: f32[2,64,64], index: 5, kind: input, shape index: {}]   ;;  %s4578_s6 = inlined_call_operand.vmem [shape: f32[2,1,64], index: 6, kind: input, shape index: {}]   ;;  %s4579_s7 = inlined_call_operand.hbm [shape: f32[2,64,64], index: 7, kind: input, shape index: {}]   ;;  %s4580_s8 = inlined_call_operand.hbm [shape: f32[2,64,64], index: 8, kind: input, shape index: {}]   ;;  %s4581_s9 = inlined_call_operand.vmem [shape: f32[2,1,64], index: 9, kind: input, shape index: {}]   ;;  %s4582_s10 = inlined_call_operand.hbm [shape: f32[6,64,64], index: 10, kind: input, shape index: {}]   ;;  %s4583_s11 = inlined_call_operand.vmem [shape: f32[9,1,64], index: 11, kind: input, shape index: {}]   ;;  %s4584_s12 = inlined_call_operand.hbm [shape: f32[9,64,64], index: 12, kind: input, shape index: {}]   ;;  %s4585_s13 = inlined_call_operand.vmem [shape: f32[8,64], index: 13, kind: output, shape index: {}]  }
   0x1   :  { %19 = vsyncpa [#allocation5], 0 }
   0x2   :  { %20 = vsyncpa [#allocation8], 0 }
   0x3   :  { %21 = vsyncpa [#allocation11], 0 }
   0x4   :  { %22 = vsyncpa [#allocation14], 0  ;;  %s4053_s25 = smov [#allocation4]   ;;  %s4054_s27 = smov [#allocation7]  }
   0x5   :  { %s42_s26 = sshll.u32 %s4053_s25, 4  ;;  %s68_s28 = sshll.u32 %s4054_s27, 4  ;;  %s43_s26 = int_to_ptr.vmem [resolvable:$true] %s42_s26  ;;  %s4136_s28 = int_to_ptr.vmem [resolvable:$true] %s68_s28 }
   0x6   :  { %s3867_s14 = scalar_lea.hbm %s4574_s2, 2048 }
   0x7   :  { %p3868_p0 = scmp.ne.s32.totalorder %s4574_s2, %s3867_s14  ;;  %p3871_p1 = scmp.lt.u32.totalorder %s3867_s14, %s4574_s2 }
   0x9   :  { %p3873_p2 = pnand %p3871_p1, %p3868_p0 }
   0xb   :  { %3876 = shalt.err (!%p3873_p2)
}
   0xc   :  { %s3877_s19 = scalar_lea.vmem %s43_s26, 2048  ;;  %p3882_p4 = scmp.lt.s32.totalorder %s43_s26, %s43_s26 }
   0xd   :  { %p3878_p3 = scmp.ne.s32.totalorder %s43_s26, %s3877_s19  ;;  %p3883_p5 = scmp.lt.s32.totalorder %s3877_s19, %s3877_s19 }
   0xf   :  { %p3884_p6 = por %p3883_p5, %p3882_p4 }
  0x11   :  { %p3885_p7 = pnand %p3884_p6, %p3878_p3 }
  0x13   :  { %3888 = shalt.err (!%p3885_p7)
}
  0x14   :  { %s4055_s20 = smov 128   ;;  %s4056_s21 = smov 8  }
  0x15   :  { %48 = dma.hbm_to_vmem [thread:$0]  %s4574_s2, 2048, %s43_s26, [#allocation5], %s4055_s20, %s4055_s20, %s4056_s21  }
  0x16   :  { %s3889_s27 = scalar_lea.hbm %s4577_s5, 2048 }
  0x17   :  { %p3890_p8 = scmp.ne.s32.totalorder %s4577_s5, %s3889_s27  ;;  %p3893_p9 = scmp.lt.u32.totalorder %s3889_s27, %s4577_s5 }
  0x19   :  { %p3895_p10 = pnand %p3893_p9, %p3890_p8 }
  0x1b   :  { %3898 = shalt.err (!%p3895_p10)
}
  0x1c   :  { %s3899_s16 = scalar_lea.vmem %s4136_s28, 2048  ;;  %p3904_p12 = scmp.lt.s32.totalorder %s4136_s28, %s4136_s28 }
  0x1d   :  { %p3900_p11 = scmp.ne.s32.totalorder %s4136_s28, %s3899_s16  ;;  %p3905_p13 = scmp.lt.s32.totalorder %s3899_s16, %s3899_s16 }
  0x1f   :  { %p3906_p0 = por %p3905_p13, %p3904_p12 }
  0x21   :  { %p3907_p1 = pnand %p3906_p0, %p3900_p11 }
  0x23   :  { %3910 = shalt.err (!%p3907_p1)
}
  0x24   :  { %74 = dma.hbm_to_vmem [thread:$0]  %s4577_s5, 2048, %s4136_s28, [#allocation8], %s4055_s20, %s4055_s20, %s4056_s21  }
  0x25   :  { %s4057_s17 = smov [#allocation10]   ;;  %s4058_s19 = smov [#allocation2]  }
  0x26   :  { %s94_s18 = sshll.u32 %s4057_s17, 4  ;;  %s30_s22 = sshll.u32 %s4058_s19, 4  ;;  %s95_s18 = int_to_ptr.vmem [resolvable:$true] %s94_s18  ;;  %s4173_s22 = int_to_ptr.vmem [resolvable:$true] %s30_s22 }
  0x27   :  { %s3911_s25 = scalar_lea.hbm %s4580_s8, 2048 }
  0x28   :  { %p3912_p2 = scmp.ne.s32.totalorder %s4580_s8, %s3911_s25  ;;  %p3915_p3 = scmp.lt.u32.totalorder %s3911_s25, %s4580_s8 }
  0x2a   :  { %p3917_p4 = pnand %p3915_p3, %p3912_p2 }
  0x2c   :  { %3920 = shalt.err (!%p3917_p4)
}
  0x2d   :  { %s3921_s5 = scalar_lea.vmem %s95_s18, 2048  ;;  %p3926_p6 = scmp.lt.s32.totalorder %s95_s18, %s95_s18 }
  0x2e   :  { %p3922_p5 = scmp.ne.s32.totalorder %s95_s18, %s3921_s5  ;;  %p3927_p7 = scmp.lt.s32.totalorder %s3921_s5, %s3921_s5 }
  0x30   :  { %p3928_p8 = por %p3927_p7, %p3926_p6 }
  0x32   :  { %p3929_p9 = pnand %p3928_p8, %p3922_p5 }
  0x34   :  { %3932 = shalt.err (!%p3929_p9)
}
  0x35   :  { %100 = dma.hbm_to_vmem [thread:$0]  %s4580_s8, 2048, %s95_s18, [#allocation11], %s4055_s20, %s4055_s20, %s4056_s21  }
  0x36   :  { %s3933_s26 = scalar_lea.hbm %s4573_s1, 2048 }
  0x37   :  { %p3934_p10 = scmp.ne.s32.totalorder %s4573_s1, %s3933_s26  ;;  %p3937_p11 = scmp.lt.u32.totalorder %s3933_s26, %s4573_s1 }
  0x39   :  { %p3939_p12 = pnand %p3937_p11, %p3934_p10 }
  0x3b   :  { %3942 = shalt.err (!%p3939_p12)
}
  0x3c   :  { %s3943_s25 = scalar_lea.vmem %s4173_s22, 2048  ;;  %p3948_p0 = scmp.lt.s32.totalorder %s4173_s22, %s4173_s22 }
  0x3d   :  { %p3944_p13 = scmp.ne.s32.totalorder %s4173_s22, %s3943_s25  ;;  %p3949_p1 = scmp.lt.s32.totalorder %s3943_s25, %s3943_s25 }
  0x3f   :  { %p3950_p2 = por %p3949_p1, %p3948_p0 }
  0x41   :  { %p3951_p3 = pnand %p3950_p2, %p3944_p13 }
  0x43   :  { %3954 = shalt.err (!%p3951_p3)
}
  0x44   :  { %36 = dma.hbm_to_vmem [thread:$0]  %s4573_s1, 2048, %s4173_s22, [#allocation3], %s4055_s20, %s4055_s20, %s4056_s21  }
  0x45   :  { %s4059_s27 = smov [#allocation6]   ;;  %s4060_s30 = smov [#allocation9]  }
  0x46   :  { %s56_s29 = sshll.u32 %s4059_s27, 4  ;;  %s82_s14 = sshll.u32 %s4060_s30, 4  ;;  %s57_s29 = int_to_ptr.vmem [resolvable:$true] %s56_s29  ;;  %s4210_s14 = int_to_ptr.vmem [resolvable:$true] %s82_s14 }
  0x47   :  { %s3955_s15 = scalar_lea.hbm %s4576_s4, 2048 }
  0x48   :  { %p3956_p4 = scmp.ne.s32.totalorder %s4576_s4, %s3955_s15  ;;  %p3959_p5 = scmp.lt.u32.totalorder %s3955_s15, %s4576_s4 }
  0x4a   :  { %p3961_p6 = pnand %p3959_p5, %p3956_p4 }
  0x4c   :  { %3964 = shalt.err (!%p3961_p6)
}
  0x4d   :  { %s3965_s1 = scalar_lea.vmem %s57_s29, 2048  ;;  %p3970_p8 = scmp.lt.s32.totalorder %s57_s29, %s57_s29 }
  0x4e   :  { %p3966_p7 = scmp.ne.s32.totalorder %s57_s29, %s3965_s1  ;;  %p3971_p9 = scmp.lt.s32.totalorder %s3965_s1, %s3965_s1 }
  0x50   :  { %p3972_p10 = por %p3971_p9, %p3970_p8 }
  0x52   :  { %p3973_p11 = pnand %p3972_p10, %p3966_p7 }
  0x54   :  { %3976 = shalt.err (!%p3973_p11)
}
  0x55   :  { %62 = dma.hbm_to_vmem [thread:$0]  %s4576_s4, 2048, %s57_s29, [#allocation5], %s4055_s20, %s4055_s20, %s4056_s21  }
  0x56   :  { %s3977_s25 = scalar_lea.hbm %s4579_s7, 2048 }
  0x57   :  { %p3978_p12 = scmp.ne.s32.totalorder %s4579_s7, %s3977_s25  ;;  %p3981_p13 = scmp.lt.u32.totalorder %s3977_s25, %s4579_s7 }
  0x59   :  { %p3983_p0 = pnand %p3981_p13, %p3978_p12 }
  0x5b   :  { %3986 = shalt.err (!%p3983_p0)
}
  0x5c   :  { %s3987_s5 = scalar_lea.vmem %s4210_s14, 2048  ;;  %p3992_p2 = scmp.lt.s32.totalorder %s4210_s14, %s4210_s14 }
  0x5d   :  { %p3988_p1 = scmp.ne.s32.totalorder %s4210_s14, %s3987_s5  ;;  %p3993_p3 = scmp.lt.s32.totalorder %s3987_s5, %s3987_s5 }
  0x5f   :  { %p3994_p4 = por %p3993_p3, %p3992_p2 }
  0x61   :  { %p3995_p5 = pnand %p3994_p4, %p3988_p1 }
  0x63   :  { %3998 = shalt.err (!%p3995_p5)
}
  0x64   :  { %88 = dma.hbm_to_vmem [thread:$0]  %s4579_s7, 2048, %s4210_s14, [#allocation8], %s4055_s20, %s4055_s20, %s4056_s21  }
  0x65   :  { %s4061_s28 = smov [#allocation12]   ;;  %s4062_s16 = smov [#allocation13]  }
  0x66   :  { %s108_s15 = sshll.u32 %s4061_s28, 4  ;;  %s122_s2 = sshll.u32 %s4062_s16, 4  ;;  %s109_s15 = int_to_ptr.vmem [resolvable:$true] %s108_s15  ;;  %s4247_s2 = int_to_ptr.vmem [resolvable:$true] %s122_s2 }
  0x67   :  { %s3999_s1 = scalar_lea.hbm %s4582_s10, 6144 }
  0x68   :  { %p4000_p6 = scmp.ne.s32.totalorder %s4582_s10, %s3999_s1  ;;  %p4003_p7 = scmp.lt.u32.totalorder %s3999_s1, %s4582_s10 }
  0x6a   :  { %p4005_p8 = pnand %p4003_p7, %p4000_p6 }
  0x6c   :  { %4008 = shalt.err (!%p4005_p8)
}
  0x6d   :  { %s4009_s7 = scalar_lea.vmem %s109_s15, 6144  ;;  %p4014_p10 = scmp.lt.s32.totalorder %s109_s15, %s109_s15 }
  0x6e   :  { %p4010_p9 = scmp.ne.s32.totalorder %s109_s15, %s4009_s7  ;;  %p4015_p11 = scmp.lt.s32.totalorder %s4009_s7, %s4009_s7 }
  0x70   :  { %p4016_p12 = por %p4015_p11, %p4014_p10 }
  0x72   :  { %p4017_p13 = pnand %p4016_p12, %p4010_p9 }
  0x74   :  { %4020 = shalt.err (!%p4017_p13)
}
  0x75   :  { %114 = dma.hbm_to_vmem [thread:$0]  %s4582_s10, 6144, %s109_s15, [#allocation11], %s4055_s20, %s4055_s20, %s4056_s21  }
  0x76   :  { %s4021_s27 = scalar_lea.hbm %s4584_s12, 9216 }
  0x77   :  { %p4022_p0 = scmp.ne.s32.totalorder %s4584_s12, %s4021_s27  ;;  %p4025_p1 = scmp.lt.u32.totalorder %s4021_s27, %s4584_s12 }
  0x79   :  { %p4027_p2 = pnand %p4025_p1, %p4022_p0 }
  0x7b   :  { %4030 = shalt.err (!%p4027_p2)
}
  0x7c   :  { %s4031_s28 = scalar_lea.vmem %s4247_s2, 9216  ;;  %p4036_p4 = scmp.lt.s32.totalorder %s4247_s2, %s4247_s2 }
  0x7d   :  { %p4032_p3 = scmp.ne.s32.totalorder %s4247_s2, %s4031_s28  ;;  %p4037_p5 = scmp.lt.s32.totalorder %s4031_s28, %s4031_s28 }
  0x7f   :  { %p4038_p6 = por %p4037_p5, %p4036_p4 }
  0x81   :  { %p4039_p7 = pnand %p4038_p6, %p4032_p3 }
  0x83   :  { %4042 = shalt.err (!%p4039_p7)
}
  0x84   :  { %128 = dma.hbm_to_vmem [thread:$0]  %s4584_s12, 9216, %s4247_s2, [#allocation14], %s4055_s20, %s4055_s20, %s4056_s21  }
  0x85   :  { %4043 = dma.done.wait [#allocation3], 2048  }
  0x86   :  { %4044 = vsyncadd [#allocation3], 4294965248 }
  0x87   :  { %4045 = dma.done.wait [#allocation5], 4096  }
  0x88   :  { %4046 = vsyncadd [#allocation5], 4294963200 }
  0x89   :  { %4047 = dma.done.wait [#allocation8], 4096  }
  0x8a   :  { %4048 = vsyncadd [#allocation8], 4294963200 }
  0x8b   :  { %4049 = dma.done.wait [#allocation11], 8192  }
  0x8c   :  { %4050 = vsyncadd [#allocation11], 4294959104 }
  0x8d   :  { %4051 = dma.done.wait [#allocation14], 9216  }
  0x8e   :  { %4052 = vsyncadd [#allocation14], 4294958080  ;;  %v4063_v0 = vmov 0.0|0.0   ;;  %vm4064_vm0 = vmmov 0   ;;  %v4065_v1 = vmov 0.0   ;;  %v162_v2 = vld [vmem:[#allocation4] sm:$0xff] }
  0x8f   :  { %3450 = vmatprep.subr.bf16.mxu0 %v4063_v0  ;;  %3462 = vmatprep.subr.bf16.mxu1 %v4063_v0  ;;  %v163_v3 = vld [vmem:[#allocation4 + $0x8] sm:$0xff]  ;;  %v154_v4 = vld [vmem:[#allocation2] sm:$0xff]  ;;  %v164_v7 = vld [vmem:[#allocation4 + $0x10] sm:$0xff]  ;;  %vm170_vm1 = vcmask 523264  }
  0x90   :  { %2953 = vmatprep.mubr.msk.f32.mxu0 %vm4064_vm0, %v4065_v1  ;;  %2972 = vmatprep.mubr.msk.f32.mxu1 %vm4064_vm0, %v4065_v1  ;;  %v3451_v5 = vpack.c.bf16 %v163_v3, %v162_v2  ;;  %v155_v6 = vld [vmem:[#allocation2 + $0x8] sm:$0xff]  ;;  %v165_v8 = vld [vmem:[#allocation4 + $0x18] sm:$0xff]  ;;  %v156_v10 = vld [vmem:[#allocation2 + $0x10] sm:$0xff] }
  0x91   :  { %v3463_v9 = vpack.c.bf16 %v155_v6, %v154_v4  ;;  %v157_v11 = vld [vmem:[#allocation2 + $0x18] sm:$0xff]  ;;  %v3454_v12 = vpack.c.bf16 %v165_v8, %v164_v7  ;;  %v166_v14 = vld [vmem:[#allocation4 + $0x20] sm:$0xff]  ;;  %v167_v15 = vld [vmem:[#allocation4 + $0x28] sm:$0xff] }
  0x92   :  { %3452 = vmatpush3.bf16.msra.mxu0 %v3451_v5  ;;  %v3466_v13 = vpack.c.bf16 %v157_v11, %v156_v10  ;;  %v158_v16 = vld [vmem:[#allocation2 + $0x20] sm:$0xff]  ;;  %v159_v17 = vld [vmem:[#allocation2 + $0x28] sm:$0xff]  ;;  %v3457_v18 = vpack.c.bf16 %v167_v15, %v166_v14  ;;  %v168_v20 = vld [vmem:[#allocation4 + $0x30] sm:$0xff] }
  0x93   :  { %3464 = vmatpush3.bf16.msra.mxu1 %v3463_v9  ;;  %3453 = vmatprep.subr.bf16.mxu0 %v4063_v0  ;;  %v3469_v19 = vpack.c.bf16 %v159_v17, %v158_v16  ;;  %v169_v21 = vld [vmem:[#allocation4 + $0x38] sm:$0xff]  ;;  %v160_v22 = vld [vmem:[#allocation2 + $0x30] sm:$0xff]  ;;  %v336_v26 = vld [vmem:[#allocation7] sm:$0xff] }
  0x94   :  { %3465 = vmatprep.subr.bf16.mxu1 %v4063_v0  ;;  %v161_v23 = vld [vmem:[#allocation2 + $0x38] sm:$0xff]  ;;  %v3460_v24 = vpack.c.bf16 %v169_v21, %v168_v20  ;;  %v337_v27 = vld [vmem:[#allocation7 + $0x8] sm:$0xff]  ;;  %v328_v28 = vld [vmem:[#allocation6] sm:$0xff] }
  0x95   :  { %v3472_v25 = vpack.c.bf16 %v161_v23, %v160_v22  ;;  %v329_v29 = vld [vmem:[#allocation6 + $0x8] sm:$0xff]  ;;  %v4299_v30 = vld [vmem:[%s4572_s0] sm:$0xff]  ;;  %v3475_v31 = vpack.c.bf16 %v337_v27, %v336_v26  ;;  %v338_v33 = vld [vmem:[#allocation7 + $0x10] sm:$0xff] }
  0x96   :  { %3455 = vmatpush3.bf16.msra.mxu0 %v3454_v12  ;;  %v3487_v32 = vpack.c.bf16 %v329_v29, %v328_v28  ;;  %v339_v34 = vld [vmem:[#allocation7 + $0x18] sm:$0xff]  ;;  %v330_v35 = vld [vmem:[#allocation6 + $0x10] sm:$0xff]  ;;  %v340_v39 = vld [vmem:[#allocation7 + $0x20] sm:$0xff] }
  0x97   :  { %3467 = vmatpush3.bf16.msra.mxu1 %v3466_v13  ;;  %3456 = vmatprep.subr.bf16.mxu0 %v4063_v0  ;;  %v331_v36 = vld [vmem:[#allocation6 + $0x18] sm:$0xff]  ;;  %v3478_v37 = vpack.c.bf16 %v339_v34, %v338_v33  ;;  %v341_v40 = vld [vmem:[#allocation7 + $0x28] sm:$0xff]  ;;  %v332_v41 = vld [vmem:[#allocation6 + $0x20] sm:$0xff] }
  0x98   :  { %3468 = vmatprep.subr.bf16.mxu1 %v4063_v0  ;;  %v3490_v38 = vpack.c.bf16 %v331_v36, %v330_v35  ;;  %v333_v42 = vld [vmem:[#allocation6 + $0x28] sm:$0xff]  ;;  %v3481_v43 = vpack.c.bf16 %v341_v40, %v340_v39  ;;  %v342_v45 = vld [vmem:[#allocation7 + $0x30] sm:$0xff]  ;;  %v343_v46 = vld [vmem:[#allocation7 + $0x38] sm:$0xff] }
  0x99   :  { %v3493_v44 = vpack.c.bf16 %v333_v42, %v332_v41  ;;  %v334_v47 = vld [vmem:[#allocation6 + $0x30] sm:$0xff]  ;;  %v335_v48 = vld [vmem:[#allocation6 + $0x38] sm:$0xff]  ;;  %v3484_v49 = vpack.c.bf16 %v343_v46, %v342_v45  ;;  %v507_v51 = vld [vmem:[#allocation10] sm:$0xff] }
  0x9a   :  { %3458 = vmatpush3.bf16.msra.mxu0 %v3457_v18  ;;  %v3496_v50 = vpack.c.bf16 %v335_v48, %v334_v47  ;;  %v508_v52 = vld [vmem:[#allocation10 + $0x8] sm:$0xff]  ;;  %v499_v54 = vld [vmem:[#allocation9] sm:$0xff]  ;;  %v509_v57 = vld [vmem:[#allocation10 + $0x10] sm:$0xff] }
  0x9b   :  { %3470 = vmatpush3.bf16.msra.mxu1 %v3469_v19  ;;  %3459 = vmatprep.subr.bf16.mxu0 %v4063_v0  ;;  %v3499_v53 = vpack.c.bf16 %v508_v52, %v507_v51  ;;  %v500_v55 = vld [vmem:[#allocation9 + $0x8] sm:$0xff]  ;;  %v510_v58 = vld [vmem:[#allocation10 + $0x18] sm:$0xff]  ;;  %v501_v60 = vld [vmem:[#allocation9 + $0x10] sm:$0xff] }
  0x9c   :  { %3471 = vmatprep.subr.bf16.mxu1 %v4063_v0  ;;  %v3511_v56 = vpack.c.bf16 %v500_v55, %v499_v54  ;;  %v3502_v59 = vpack.c.bf16 %v510_v58, %v509_v57  ;;  %v502_v61 = vld [vmem:[#allocation9 + $0x18] sm:$0xff]  ;;  %v511_v63 = vld [vmem:[#allocation10 + $0x20] sm:$0xff]  ;;  %v512_v2 = vld [vmem:[#allocation10 + $0x28] sm:$0xff] }
  0x9d   :  { %v3514_v62 = vpack.c.bf16 %v502_v61, %v501_v60  ;;  %v503_v3 = vld [vmem:[#allocation9 + $0x20] sm:$0xff]  ;;  %v3505_v4 = vpack.c.bf16 %v512_v2, %v511_v63  ;;  %v504_v5 = vld [vmem:[#allocation9 + $0x28] sm:$0xff]  ;;  %v513_v7 = vld [vmem:[#allocation10 + $0x30] sm:$0xff] }
  0x9e   :  { %3461 = vmatpush3.bf16.msra.mxu0 %v3460_v24  ;;  %v3517_v6 = vpack.c.bf16 %v504_v5, %v503_v3  ;;  %v514_v8 = vld [vmem:[#allocation10 + $0x38] sm:$0xff]  ;;  %v505_v9 = vld [vmem:[#allocation9 + $0x30] sm:$0xff]  ;;  %v2628_v20 = vld [vmem:[%s4578_s6] ss:$0 sm:$0xff] }
  0x9f   :  { %3473 = vmatpush3.bf16.msra.mxu1 %v3472_v25  ;;  %3474 = vmatprep.subr.bf16.mxu0 %v4063_v0  ;;  %v506_v10 = vld [vmem:[#allocation9 + $0x38] sm:$0xff]  ;;  %v3508_v11 = vpack.c.bf16 %v514_v8, %v513_v7  ;;  %v674_v33 = vld [vmem:[#allocation2 + $0x40] sm:$0xff]  ;;  %v675_v34 = vld [vmem:[#allocation2 + $0x48] sm:$0xff] }
  0xa0   :  { %3486 = vmatprep.subr.bf16.mxu1 %v4063_v0  ;;  %v3520_v12 = vpack.c.bf16 %v506_v10, %v505_v9  ;;  %v3535_v35 = vpack.c.bf16 %v675_v34, %v674_v33  ;;  %v683_v36 = vld [vmem:[#allocation4 + $0x40] sm:$0xff]  ;;  %v676_v39 = vld [vmem:[#allocation2 + $0x50] sm:$0xff]  ;;  %v677_v40 = vld [vmem:[#allocation2 + $0x58] sm:$0xff] }
  0xa1   :  { %2954 = vmatmul.mubr.msk.f32.vlgmr.msra.gmra.mrb[0].mxu0 %vm170_vm1, %v4299_v30  ;;  %v3538_v41 = vpack.c.bf16 %v677_v40, %v676_v39  ;;  %v685_v42 = vld [vmem:[#allocation4 + $0x50] sm:$0xff]  ;;  %v678_v45 = vld [vmem:[#allocation2 + $0x60] sm:$0xff]  ;;  %v679_v46 = vld [vmem:[#allocation2 + $0x68] sm:$0xff] }
  0xa2   :  { %2973 = vmatmul.mubr.msk.f32.vlgmr.msra.gmra.mrb[0].mxu1 %vm170_vm1, %v4299_v30  ;;  %3476 = vmatpush3.bf16.msra.mxu0 %v3475_v31  ;;  %v3541_v47 = vpack.c.bf16 %v679_v46, %v678_v45  ;;  %v687_v48 = vld [vmem:[#allocation4 + $0x60] sm:$0xff]  ;;  %v680_v51 = vld [vmem:[#allocation2 + $0x70] sm:$0xff]  ;;  %v681_v52 = vld [vmem:[#allocation2 + $0x78] sm:$0xff] }
  0xa3   :  { %3488 = vmatpush3.bf16.msra.mxu1 %v3487_v32  ;;  %3477 = vmatprep.subr.bf16.mxu0 %v4063_v0  ;;  %v689_v54 = vld [vmem:[#allocation4 + $0x70] sm:$0xff]  ;;  %v690_v55 = vld [vmem:[#allocation4 + $0x78] sm:$0xff]  ;;  %v850_v57 = vld [vmem:[#allocation6 + $0x40] sm:$0xff] }
  0xa4   :  { %3489 = vmatprep.subr.bf16.mxu1 %v4063_v0  ;;  %2991 = vmatprep.mubr.msk.f32.mxu0 %vm4064_vm0, %v4065_v1  ;;  %v851_v58 = vld [vmem:[#allocation6 + $0x48] sm:$0xff]  ;;  %v852_v60 = vld [vmem:[#allocation6 + $0x50] sm:$0xff]  ;;  %v853_v61 = vld [vmem:[#allocation6 + $0x58] sm:$0xff] }
  0xa5   :  { %3010 = vmatprep.mubr.msk.f32.mxu1 %vm4064_vm0, %v4065_v1  ;;  %v854_v63 = vld [vmem:[#allocation6 + $0x60] sm:$0xff]  ;;  %v855_v2 = vld [vmem:[#allocation6 + $0x68] sm:$0xff]  ;;  %v857_v5 = vld [vmem:[#allocation6 + $0x78] sm:$0xff] }
  0xa6   :  { %3479 = vmatpush3.bf16.msra.mxu0 %v3478_v37  ;;  %v684_v37 = vld [vmem:[#allocation4 + $0x48] sm:$0xff]  ;;  %v3565_v3 = vpack.c.bf16 %v855_v2, %v854_v63  ;;  %v2624_v7 = vld [vmem:[%s4575_s3] ss:$0 sm:$0xff]  ;;  %v1031_v63 = vld [vmem:[#allocation9 + $0x78] sm:$0xff] }
  0xa7   :  { %3491 = vmatpush3.bf16.msra.mxu1 %v3490_v38  ;;  %3480 = vmatprep.subr.bf16.mxu0 %v4063_v0  ;;  %v3523_v38 = vpack.c.bf16 %v684_v37, %v683_v36  ;;  %v864_v33 = vld [vmem:[#allocation7 + $0x68] sm:$0xff]  ;;  %v866_v36 = vld [vmem:[#allocation7 + $0x78] sm:$0xff]  ;;  %v1024_v45 = vld [vmem:[#allocation9 + $0x40] sm:$0xff] }
  0xa8   :  { %3492 = vmatprep.subr.bf16.mxu1 %v4063_v0  ;;  %v1025_v46 = vld [vmem:[#allocation9 + $0x48] sm:$0xff] }
  0xaa   :  { %3482 = vmatpush3.bf16.msra.mxu0 %v3481_v43  ;;  %v686_v43 = vld [vmem:[#allocation4 + $0x58] sm:$0xff] }
  0xab   :  { %3494 = vmatpush3.bf16.msra.mxu1 %v3493_v44  ;;  %3483 = vmatprep.subr.bf16.mxu0 %v4063_v0  ;;  %v3526_v44 = vpack.c.bf16 %v686_v43, %v685_v42  ;;  %v1033_v42 = vld [vmem:[#allocation10 + $0x40] sm:$0xff]  ;;  %v1034_v43 = vld [vmem:[#allocation10 + $0x48] sm:$0xff] }
  0xac   :  { %3495 = vmatprep.subr.bf16.mxu1 %v4063_v0 }
  0xae   :  { %3485 = vmatpush3.bf16.msra.mxu0 %v3484_v49  ;;  %v688_v49 = vld [vmem:[#allocation4 + $0x68] sm:$0xff] }
  0xaf   :  { %3497 = vmatpush3.bf16.msra.mxu1 %v3496_v50  ;;  %3498 = vmatprep.subr.bf16.mxu0 %v4063_v0  ;;  %v3529_v50 = vpack.c.bf16 %v688_v49, %v687_v48  ;;  %v1035_v48 = vld [vmem:[#allocation10 + $0x50] sm:$0xff]  ;;  %v1036_v49 = vld [vmem:[#allocation10 + $0x58] sm:$0xff] }
  0xb0   :  { %3510 = vmatprep.subr.bf16.mxu1 %v4063_v0 }
  0xb1   :  { %2992 = vmatmul.mubr.msk.f32.vlgmr.msra.gmra.mrb[2].mxu0 %vm170_vm1, %v4299_v30 }
  0xb2   :  { %3011 = vmatmul.mubr.msk.f32.vlgmr.msra.gmra.mrb[2].mxu1 %vm170_vm1, %v4299_v30  ;;  %3029 = vmatprep.mubr.msk.f32.mxu0 %vm4064_vm0, %v4065_v1 }
  0xb3   :  { %3048 = vmatprep.mubr.msk.f32.mxu1 %vm4064_vm0, %v4065_v1  ;;  %3500 = vmatpush3.bf16.msra.mxu0 %v3499_v53  ;;  %v3544_v53 = vpack.c.bf16 %v681_v52, %v680_v51  ;;  %v1026_v51 = vld [vmem:[#allocation9 + $0x50] sm:$0xff]  ;;  %v1027_v52 = vld [vmem:[#allocation9 + $0x58] sm:$0xff] }
  0xb4   :  { %3512 = vmatpush3.bf16.msra.mxu1 %v3511_v56  ;;  %3501 = vmatprep.subr.bf16.mxu0 %v4063_v0  ;;  %v3532_v56 = vpack.c.bf16 %v690_v55, %v689_v54  ;;  %v1037_v54 = vld [vmem:[#allocation10 + $0x60] sm:$0xff]  ;;  %v1038_v55 = vld [vmem:[#allocation10 + $0x68] sm:$0xff] }
  0xb5   :  { %3513 = vmatprep.subr.bf16.mxu1 %v4063_v0 }
  0xb7   :  { %3503 = vmatpush3.bf16.msra.mxu0 %v3502_v59  ;;  %v3559_v59 = vpack.c.bf16 %v851_v58, %v850_v57  ;;  %v3577_v57 = vpack.c.bf16 %v1038_v55, %v1037_v54  ;;  %v1029_v58 = vld [vmem:[#allocation9 + $0x68] sm:$0xff] }
  0xb8   :  { %3515 = vmatpush3.bf16.msra.mxu1 %v3514_v62  ;;  %3504 = vmatprep.subr.bf16.mxu0 %v4063_v0  ;;  %v3562_v62 = vpack.c.bf16 %v853_v61, %v852_v60  ;;  %v1039_v60 = vld [vmem:[#allocation10 + $0x70] sm:$0xff]  ;;  %v1040_v61 = vld [vmem:[#allocation10 + $0x78] sm:$0xff] }
  0xb9   :  { %3516 = vmatprep.subr.bf16.mxu1 %v4063_v0  ;;  %v3580_v2 = vpack.c.bf16 %v1040_v61, %v1039_v60 }
  0xbb   :  { %3506 = vmatpush3.bf16.msra.mxu0 %v3505_v4  ;;  %v856_v4 = vld [vmem:[#allocation6 + $0x70] sm:$0xff] }
  0xbc   :  { %3518 = vmatpush3.bf16.msra.mxu1 %v3517_v6  ;;  %3507 = vmatprep.subr.bf16.mxu0 %v4063_v0  ;;  %v3568_v6 = vpack.c.bf16 %v857_v5, %v856_v4 }
  0xbd   :  { %3519 = vmatprep.subr.bf16.mxu1 %v4063_v0 }
  0xbf   :  { %3509 = vmatpush3.bf16.msra.mxu0 %v3508_v11 }
  0xc0   :  { %3521 = vmatpush3.bf16.msra.mxu1 %v3520_v12  ;;  %3522 = vmatprep.subr.bf16.mxu0 %v4063_v0 }
  0xc1   :  { %3534 = vmatprep.subr.bf16.mxu1 %v4063_v0 }
  0xc2   :  { %3030 = vmatmul.mubr.msk.f32.vlgmr.msra.gmra.mrb[4].mxu0 %vm170_vm1, %v4299_v30 }
  0xc3   :  { %3067 = vmatprep.mubr.msk.f32.mxu0 %vm4064_vm0, %v4065_v1  ;;  %3524 = vmatpush3.bf16.msra.mxu0 %v3523_v38 }
  0xc4   :  { %3525 = vmatprep.subr.bf16.mxu0 %v4063_v0 }
  0xc7   :  { %3527 = vmatpush3.bf16.msra.mxu0 %v3526_v44  ;;  %v3571_v44 = vpack.c.bf16 %v1034_v43, %v1033_v42  ;;  %v1234_v42 = vld [vmem:[#allocation13 + $0x30] sm:$0xff]  ;;  %v1235_v43 = vld [vmem:[#allocation13 + $0x38] sm:$0xff] }
  0xc8   :  { %3528 = vmatprep.subr.bf16.mxu0 %v4063_v0 }
  0xcb   :  { %3530 = vmatpush3.bf16.msra.mxu0 %v3529_v50  ;;  %v3574_v50 = vpack.c.bf16 %v1036_v49, %v1035_v48 }
  0xcc   :  { %3531 = vmatprep.subr.bf16.mxu0 %v4063_v0 }
  0xcf   :  { %3533 = vmatpush3.bf16.msra.mxu0 %v3532_v56  ;;  %v1028_v56 = vld [vmem:[#allocation9 + $0x60] sm:$0xff] }
  0xd0   :  { %3546 = vmatprep.subr.bf16.mxu0 %v4063_v0 }
 0x174   :  { %v240_v13 = vpop.f32.mrb[0].mxu0 }
 0x175   :  { %v310_v14 = vpop.f32.mrb[0].mxu1  ;;  %v2955_v15 = vpop.f32.mrb[1].mxu0 }
 0x176   :  { %v4339_v16 = vadd.f32 %v310_v14, %v240_v13  ;;  %v2974_v17 = vpop.f32.mrb[1].mxu1  ;;  %v2632_v13 = vld [vmem:[%s4581_s9] ss:$0 sm:$0xff] }
 0x178   :  { %v321_v8 = vadd.f32 %v2624_v7, %v4339_v16 }
 0x17a   :  { %v2625_v9 = vmul.f32 -1.442695, %v321_v8  ;;  %v2641_v8 = vld [vmem:[%s4578_s6 + $0x1] ss:$0 sm:$0xff] }
 0x184   :  { %v410_v18 = vpop.f32.mrb[2].mxu0 }
 0x185   :  { %v480_v19 = vpop.f32.mrb[2].mxu1  ;;  %v2993_v21 = vpop.f32.mrb[3].mxu0 }
 0x186   :  { %v481_v22 = vadd.f32 %v480_v19, %v410_v18  ;;  %v3012_v23 = vpop.f32.mrb[3].mxu1 }
 0x187   :  { %v859_v23 = vld [vmem:[#allocation7 + $0x40] sm:$0xff] }
 0x188   :  { %v491_v24 = vadd.f32 %v2628_v20, %v481_v22  ;;  %v4380_v22 = vmul.f32 0.05, %v4299_v30 }
 0x18a   :  { %v2629_v25 = vmul.f32 -1.442695, %v491_v24  ;;  %v860_v24 = vld [vmem:[#allocation7 + $0x48] sm:$0xff] }
 0x18c   :  { %3787 = vpow2.f32 %v2629_v25 }
 0x195   :  { %v4348_v31 = vpop.f32.mrb[4].mxu0 }
 0x196   :  { %v3788_v26 = vpop.eup %3787  ;;  %v3031_v32 = vpop.f32.mrb[5].mxu0 }
 0x197   :  { %v495_v27 = vadd.f32 1.0, %v3788_v26  ;;  %v3547_v26 = vpack.c.bf16 %v860_v24, %v859_v23  ;;  %v863_v32 = vld [vmem:[#allocation7 + $0x60] sm:$0xff]  ;;  %v1229_v23 = vld [vmem:[#allocation13 + $0x8] sm:$0xff]  ;;  %v1207_v24 = vld [vmem:[#allocation12 + $0x10] sm:$0xff] }
 0x198   :  { %v3553_v34 = vpack.c.bf16 %v864_v33, %v863_v32  ;;  %v1209_v32 = vld [vmem:[#allocation12 + $0x20] sm:$0xff] }
 0x199   :  { %3789 = vrcp.f32 %v495_v27 }
 0x19a   :  { %3791 = vpow2.f32 %v2625_v9 }
 0x1a3   :  { %v3790_v28 = vpop.eup %3789 }
 0x1a4   :  { %v498_v29 = vmul.f32 %v3790_v28, %v4299_v30  ;;  %v3792_v10 = vpop.eup %3791  ;;  %v861_v28 = vld [vmem:[#allocation7 + $0x50] sm:$0xff] }
 0x1a5   :  { %v325_v11 = vadd.f32 1.0, %v3792_v10 }
 0x1a6   :  { %3049 = vmatmul.mubr.msk.f32.vlgmr.msra.gmra.mrb[4].mxu1 %vm170_vm1, %v498_v29  ;;  %v862_v29 = vld [vmem:[#allocation7 + $0x58] sm:$0xff] }
 0x1a7   :  { %3086 = vmatprep.mubr.msk.f32.mxu1 %vm4064_vm0, %v4065_v1  ;;  %3536 = vmatpush3.bf16.msra.mxu1 %v3535_v35  ;;  %3793 = vrcp.f32 %v325_v11  ;;  %v865_v35 = vld [vmem:[#allocation7 + $0x70] sm:$0xff] }
 0x1a8   :  { %3537 = vmatprep.subr.bf16.mxu1 %v4063_v0  ;;  %v3556_v37 = vpack.c.bf16 %v866_v36, %v865_v35  ;;  %v1232_v36 = vld [vmem:[#allocation13 + $0x20] sm:$0xff] }
 0x1ab   :  { %3539 = vmatpush3.bf16.msra.mxu1 %v3538_v41 }
 0x1ac   :  { %3540 = vmatprep.subr.bf16.mxu1 %v4063_v0 }
 0x1af   :  { %3542 = vmatpush3.bf16.msra.mxu1 %v3541_v47  ;;  %v3583_v47 = vpack.c.bf16 %v1025_v46, %v1024_v45  ;;  %v2636_v45 = vld [vmem:[%s4575_s3 + $0x1] ss:$0 sm:$0xff] }
 0x1b0   :  { %3543 = vmatprep.subr.bf16.mxu1 %v4063_v0 }
 0x1b1   :  { %v3794_v18 = vpop.eup %3793 }
 0x1b2   :  { %v667_v19 = vsub.f32 1.0, %v3794_v18 }
 0x1b3   :  { %3545 = vmatpush3.bf16.msra.mxu1 %v3544_v53  ;;  %v3586_v53 = vpack.c.bf16 %v1027_v52, %v1026_v51  ;;  %v2646_v51 = vld [vmem:[%s4581_s9 + $0x1] ss:$0 sm:$0xff] }
 0x1b4   :  { %3558 = vmatprep.subr.bf16.mxu1 %v4063_v0  ;;  %v668_v16 = vmul.f32 %v667_v19, %v4299_v30  ;;  %v1205_v19 = vld [vmem:[#allocation12] sm:$0xff] }
 0x1b6   :  { %3087 = vmatmul.mubr.msk.f32.vlgmr.msra.gmra.mrb[6].mxu1 %vm170_vm1, %v4299_v30 }
 0x1b7   :  { %3560 = vmatpush3.bf16.msra.mxu1 %v3559_v59  ;;  %3124 = vmatprep.mubr.msk.f32.mxu1 %vm4064_vm0, %v4065_v1  ;;  %v3589_v59 = vpack.c.bf16 %v1029_v58, %v1028_v56 }
 0x1b8   :  { %3561 = vmatprep.subr.bf16.mxu1 %v4063_v0 }
 0x1bb   :  { %3563 = vmatpush3.bf16.msra.mxu1 %v3562_v62  ;;  %v1030_v62 = vld [vmem:[#allocation9 + $0x70] sm:$0xff] }
 0x1bc   :  { %3564 = vmatprep.subr.bf16.mxu1 %v4063_v0 }
 0x1bf   :  { %3566 = vmatpush3.bf16.msra.mxu1 %v3565_v3  ;;  %v3592_v3 = vpack.c.bf16 %v1031_v63, %v1030_v62  ;;  %v2648_v62 = vld [vmem:[%s4583_s11] ss:$0 sm:$0xff] }
 0x1c0   :  { %3567 = vmatprep.subr.bf16.mxu1 %v4063_v0 }
 0x1c3   :  { %3569 = vmatpush3.bf16.msra.mxu1 %v3568_v6 }
 0x1c4   :  { %3582 = vmatprep.subr.bf16.mxu1 %v4063_v0 }
 0x1c6   :  { %3125 = vmatmul.mubr.msk.f32.vlgmr.msra.gmra.mrb[8].mxu1 %vm170_vm1, %v4299_v30 }
 0x1c7   :  { %3162 = vmatprep.mubr.msk.f32.mxu1 %vm4064_vm0, %v4065_v1  ;;  %3584 = vmatpush3.bf16.msra.mxu1 %v3583_v47 }
 0x1c8   :  { %3585 = vmatprep.subr.bf16.mxu1 %v4063_v0 }
 0x1cb   :  { %3587 = vmatpush3.bf16.msra.mxu1 %v3586_v53 }
 0x1cc   :  { %3588 = vmatprep.subr.bf16.mxu1 %v4063_v0 }
 0x1cf   :  { %3590 = vmatpush3.bf16.msra.mxu1 %v3589_v59 }
 0x1d0   :  { %3591 = vmatprep.subr.bf16.mxu1 %v4063_v0 }
 0x1d3   :  { %3593 = vmatpush3.bf16.msra.mxu1 %v3592_v3 }
 0x1d4   :  { %3606 = vmatprep.subr.bf16.mxu1 %v4063_v0 }
 0x279   :  { %v654_v12 = vpop.f32.mrb[4].mxu1 }
 0x27a   :  { %v655_v14 = vadd.f32 %v654_v12, %v4348_v31  ;;  %v3050_v15 = vpop.f32.mrb[5].mxu1  ;;  %v3550_v31 = vpack.c.bf16 %v862_v29, %v861_v28  ;;  %v1230_v29 = vld [vmem:[#allocation13 + $0x10] sm:$0xff] }
 0x27c   :  { %v665_v17 = vadd.f32 %v2632_v13, %v655_v14 }
 0x27e   :  { %3795 = vtanh.f32 %v665_v17 }
 0x288   :  { %v3796_v20 = vpop.eup %3795 }
 0x289   :  { %v669_v21 = vmul.f32 %v3796_v20, %v3794_v18  ;;  %v830_v38 = vpop.f32.mrb[6].mxu1  ;;  %v1206_v20 = vld [vmem:[#allocation12 + $0x8] sm:$0xff] }
 0x28a   :  { %v3088_v39 = vpop.f32.mrb[7].mxu1 }
 0x28b   :  { %v670_v25 = vadd.f32 %v669_v21, %v668_v16  ;;  %v3607_v21 = vpack.c.bf16 %v1206_v20, %v1205_v19  ;;  %v1228_v16 = vld [vmem:[#allocation13] sm:$0xff]  ;;  %v1418_v19 = vld [vmem:[#allocation13 + $0x58] sm:$0xff] }
 0x28d   :  { %v4383_v27 = vadd.f32 %v4380_v22, %v670_v25  ;;  %v3595_v25 = vpack.c.bf16 %v1229_v23, %v1228_v16  ;;  %v1395_v16 = vld [vmem:[#allocation12 + $0x68] sm:$0xff] }
 0x28f   :  { %3068 = vmatmul.mubr.msk.f32.vlgmr.msra.gmra.mrb[6].mxu0 %vm170_vm1, %v4383_v27 }
 0x290   :  { %3548 = vmatpush3.bf16.msra.mxu0 %v3547_v26  ;;  %3105 = vmatprep.mubr.msk.f32.mxu0 %vm4064_vm0, %v4065_v1  ;;  %v1208_v26 = vld [vmem:[#allocation12 + $0x18] sm:$0xff] }
 0x291   :  { %3549 = vmatprep.subr.bf16.mxu0 %v4063_v0  ;;  %v3610_v28 = vpack.c.bf16 %v1208_v26, %v1207_v24  ;;  %v1419_v24 = vld [vmem:[#allocation13 + $0x60] sm:$0xff]  ;;  %v1396_v26 = vld [vmem:[#allocation12 + $0x70] sm:$0xff] }
 0x294   :  { %3551 = vmatpush3.bf16.msra.mxu0 %v3550_v31  ;;  %v1231_v31 = vld [vmem:[#allocation13 + $0x18] sm:$0xff] }
 0x295   :  { %3552 = vmatprep.subr.bf16.mxu0 %v4063_v0  ;;  %v3598_v33 = vpack.c.bf16 %v1231_v31, %v1230_v29  ;;  %v1397_v29 = vld [vmem:[#allocation12 + $0x78] sm:$0xff]  ;;  %v1421_v31 = vld [vmem:[#allocation13 + $0x70] sm:$0xff] }
 0x298   :  { %3554 = vmatpush3.bf16.msra.mxu0 %v3553_v34  ;;  %v1210_v34 = vld [vmem:[#allocation12 + $0x28] sm:$0xff] }
 0x299   :  { %3555 = vmatprep.subr.bf16.mxu0 %v4063_v0  ;;  %v1003_v40 = vpop.f32.mrb[8].mxu1  ;;  %v3613_v35 = vpack.c.bf16 %v1210_v34, %v1209_v32  ;;  %v1422_v32 = vld [vmem:[#allocation13 + $0x78] sm:$0xff] }
 0x29a   :  { %v3126_v41 = vpop.f32.mrb[9].mxu1  ;;  %v3628_v34 = vpack.c.bf16 %v1422_v32, %v1421_v31  ;;  %v1707_v31 = vld [vmem:[#allocation13 + $0xf8] sm:$0xff] }
 0x29c   :  { %3557 = vmatpush3.bf16.msra.mxu0 %v3556_v37  ;;  %v1233_v37 = vld [vmem:[#allocation13 + $0x28] sm:$0xff] }
 0x29d   :  { %3570 = vmatprep.subr.bf16.mxu0 %v4063_v0  ;;  %v3601_v39 = vpack.c.bf16 %v1233_v37, %v1232_v36 }
 0x29f   :  { %3106 = vmatmul.mubr.msk.f32.vlgmr.msra.gmra.mrb[8].mxu0 %vm170_vm1, %v4383_v27 }
 0x2a0   :  { %3143 = vmatprep.mubr.msk.f32.mxu0 %vm4064_vm0, %v4065_v1  ;;  %3572 = vmatpush3.bf16.msra.mxu0 %v3571_v44  ;;  %v3604_v44 = vpack.c.bf16 %v1235_v43, %v1234_v42 }
 0x2a1   :  { %3573 = vmatprep.subr.bf16.mxu0 %v4063_v0 }
 0x2a4   :  { %3575 = vmatpush3.bf16.msra.mxu0 %v3574_v50 }
 0x2a5   :  { %3576 = vmatprep.subr.bf16.mxu0 %v4063_v0 }
 0x2a8   :  { %3578 = vmatpush3.bf16.msra.mxu0 %v3577_v57 }
 0x2a9   :  { %3579 = vmatprep.subr.bf16.mxu0 %v4063_v0 }
 0x2ac   :  { %3581 = vmatpush3.bf16.msra.mxu0 %v3580_v2 }
 0x2ad   :  { %3594 = vmatprep.subr.bf16.mxu0 %v4063_v0 }
 0x2af   :  { %3144 = vmatmul.mubr.msk.f32.vlgmr.msra.gmra.mrb[10].mxu0 %vm170_vm1, %v4299_v30 }
 0x2b0   :  { %3181 = vmatprep.mubr.msk.f32.mxu0 %vm4064_vm0, %v4065_v1  ;;  %3596 = vmatpush3.bf16.msra.mxu0 %v3595_v25  ;;  %v1420_v25 = vld [vmem:[#allocation13 + $0x68] sm:$0xff] }
 0x2b1   :  { %3597 = vmatprep.subr.bf16.mxu0 %v4063_v0 }
 0x2b4   :  { %3599 = vmatpush3.bf16.msra.mxu0 %v3598_v33  ;;  %v3640_v33 = vpack.c.bf16 %v1397_v29, %v1396_v26  ;;  %v1682_v26 = vld [vmem:[#allocation12 + $0xb8] sm:$0xff]  ;;  %v1706_v29 = vld [vmem:[#allocation13 + $0xf0] sm:$0xff] }
 0x2b5   :  { %3600 = vmatprep.subr.bf16.mxu0 %v4063_v0  ;;  %v3664_v32 = vpack.c.bf16 %v1707_v31, %v1706_v29 }
 0x2b8   :  { %3602 = vmatpush3.bf16.msra.mxu0 %v3601_v39 }
 0x2b9   :  { %3603 = vmatprep.subr.bf16.mxu0 %v4063_v0 }
 0x2bc   :  { %3605 = vmatpush3.bf16.msra.mxu0 %v3604_v44 }
 0x2bd   :  { %3618 = vmatprep.subr.bf16.mxu0 %v4063_v0 }
 0x362   :  { %v760_v4 = vpop.f32.mrb[6].mxu0 }
 0x363   :  { %v831_v5 = vadd.f32 %v830_v38, %v760_v4  ;;  %v3069_v6 = vpop.f32.mrb[7].mxu0  ;;  %v1211_v38 = vld [vmem:[#allocation12 + $0x30] sm:$0xff] }
 0x365   :  { %v842_v46 = vadd.f32 %v2636_v45, %v831_v5 }
 0x367   :  { %v2637_v47 = vmul.f32 -1.442695, %v842_v46  ;;  %v2659_v46 = vld [vmem:[%s4583_s11 + $0x2] ss:$0 sm:$0xff] }
 0x372   :  { %v933_v7 = vpop.f32.mrb[8].mxu0 }
 0x373   :  { %v1004_v9 = vadd.f32 %v1003_v40, %v933_v7  ;;  %v3107_v10 = vpop.f32.mrb[9].mxu0  ;;  %v1212_v40 = vld [vmem:[#allocation12 + $0x38] sm:$0xff] }
 0x374   :  { %v3616_v41 = vpack.c.bf16 %v1212_v40, %v1211_v38  ;;  %v1391_v10 = vld [vmem:[#allocation12 + $0x48] sm:$0xff] }
 0x375   :  { %v1015_v11 = vadd.f32 %v2641_v8, %v1004_v9  ;;  %v1390_v9 = vld [vmem:[#allocation12 + $0x40] sm:$0xff] }
 0x377   :  { %v2642_v12 = vmul.f32 -1.442695, %v1015_v11  ;;  %v3631_v11 = vpack.c.bf16 %v1391_v10, %v1390_v9  ;;  %v1700_v10 = vld [vmem:[#allocation13 + $0xc0] sm:$0xff] }
 0x379   :  { %3797 = vpow2.f32 %v2642_v12  ;;  %v1415_v12 = vld [vmem:[#allocation13 + $0x40] sm:$0xff] }
 0x382   :  { %v1107_v17 = vpop.f32.mrb[10].mxu0 }
 0x383   :  { %v3798_v13 = vpop.eup %3797  ;;  %v3145_v18 = vpop.f32.mrb[11].mxu0 }
 0x384   :  { %v1019_v14 = vadd.f32 1.0, %v3798_v13  ;;  %v1416_v13 = vld [vmem:[#allocation13 + $0x48] sm:$0xff]  ;;  %v1417_v18 = vld [vmem:[#allocation13 + $0x50] sm:$0xff] }
 0x385   :  { %v3622_v20 = vpack.c.bf16 %v1418_v19, %v1417_v18  ;;  %v1679_v18 = vld [vmem:[#allocation12 + $0xa0] sm:$0xff] }
 0x386   :  { %3799 = vrcp.f32 %v1019_v14  ;;  %v3619_v14 = vpack.c.bf16 %v1416_v13, %v1415_v12  ;;  %v1677_v12 = vld [vmem:[#allocation12 + $0x90] sm:$0xff] }
 0x387   :  { %3801 = vpow2.f32 %v2637_v47 }
 0x390   :  { %v3800_v30 = vpop.eup %3799 }
 0x391   :  { %v1022_v15 = vmul.f32 %v3800_v30, %v4383_v27  ;;  %v3802_v48 = vpop.eup %3801  ;;  %v1392_v30 = vld [vmem:[#allocation12 + $0x50] sm:$0xff] }
 0x392   :  { %v846_v49 = vadd.f32 1.0, %v3802_v48 }
 0x393   :  { %3163 = vmatmul.mubr.msk.f32.vlgmr.msra.gmra.mrb[10].mxu1 %vm170_vm1, %v1022_v15  ;;  %v1393_v15 = vld [vmem:[#allocation12 + $0x58] sm:$0xff] }
 0x394   :  { %3200 = vmatprep.mubr.msk.f32.mxu1 %vm4064_vm0, %v4065_v1  ;;  %3608 = vmatpush3.bf16.msra.mxu1 %v3607_v21  ;;  %3803 = vrcp.f32 %v846_v49  ;;  %v1394_v21 = vld [vmem:[#allocation12 + $0x60] sm:$0xff] }
 0x395   :  { %3609 = vmatprep.subr.bf16.mxu1 %v4063_v0  ;;  %v3637_v23 = vpack.c.bf16 %v1395_v16, %v1394_v21  ;;  %v1704_v16 = vld [vmem:[#allocation13 + $0xe0] sm:$0xff] }
 0x398   :  { %3611 = vmatpush3.bf16.msra.mxu1 %v3610_v28  ;;  %v3625_v28 = vpack.c.bf16 %v1420_v25, %v1419_v24  ;;  %v1681_v24 = vld [vmem:[#allocation12 + $0xb0] sm:$0xff] }
 0x399   :  { %3612 = vmatprep.subr.bf16.mxu1 %v4063_v0 }
 0x39c   :  { %3614 = vmatpush3.bf16.msra.mxu1 %v3613_v35 }
 0x39d   :  { %3615 = vmatprep.subr.bf16.mxu1 %v4063_v0 }
 0x39e   :  { %v3804_v55 = vpop.eup %3803 }
 0x39f   :  { %v1194_v56 = vsub.f32 1.0, %v3804_v55 }
 0x3a0   :  { %3617 = vmatpush3.bf16.msra.mxu1 %v3616_v41  ;;  %v2654_v41 = vld [vmem:[%s4583_s11 + $0x1] ss:$0 sm:$0xff] }
 0x3a1   :  { %3630 = vmatprep.subr.bf16.mxu1 %v4063_v0  ;;  %v1195_v58 = vmul.f32 %v1194_v56, %v4383_v27 }
 0x466   :  { %v1180_v50 = vpop.f32.mrb[10].mxu1 }
 0x467   :  { %v1181_v52 = vadd.f32 %v1180_v50, %v1107_v17  ;;  %v3164_v53 = vpop.f32.mrb[11].mxu1  ;;  %v3634_v17 = vpack.c.bf16 %v1393_v15, %v1392_v30  ;;  %v1702_v15 = vld [vmem:[#allocation13 + $0xd0] sm:$0xff] }
 0x468   :  { %v1585_v53 = vld [vmem:[#allocation13 + $0x80] sm:$0xff] }
 0x469   :  { %v1192_v54 = vadd.f32 %v2646_v51, %v1181_v52 }
 0x46b   :  { %3805 = vtanh.f32 %v1192_v54  ;;  %v1586_v54 = vld [vmem:[#allocation13 + $0x88] sm:$0xff] }
 0x46c   :  { %v3643_v56 = vpack.c.bf16 %v1586_v54, %v1585_v53  ;;  %v1863_v53 = vld [vmem:[#allocation12 + $0xc8] sm:$0xff] }
 0x475   :  { %v3806_v57 = vpop.eup %3805 }
 0x476   :  { %v1196_v59 = vmul.f32 %v3806_v57, %v3804_v55 }
 0x478   :  { %v1197_v60 = vadd.f32 %v1196_v59, %v1195_v58  ;;  %v1587_v58 = vld [vmem:[#allocation13 + $0x90] sm:$0xff]  ;;  %v1588_v59 = vld [vmem:[#allocation13 + $0x98] sm:$0xff] }
 0x47a   :  { %v4432_v61 = vadd.f32 %v1197_v60, %v4380_v22 }
 0x47c   :  { %v2647_v63 = vmul.f32 -1.442695, %v4432_v61  ;;  %v1213_v2 = vmul.f32 2.0, %v4432_v61 }
 0x47e   :  { %3807 = vpow2.f32 %v2647_v63  ;;  %v1221_v3 = vsub.f32 %v1213_v2, %v2648_v62  ;;  %v3646_v63 = vpack.c.bf16 %v1588_v59, %v1587_v58  ;;  %v1589_v2 = vld [vmem:[#allocation13 + $0xa0] sm:$0xff]  ;;  %v1864_v58 = vld [vmem:[#allocation12 + $0xd0] sm:$0xff]  ;;  %v1865_v59 = vld [vmem:[#allocation12 + $0xd8] sm:$0xff] }
 0x480   :  { %v2649_v4 = vmul.f32 -1.442695, %v1221_v3  ;;  %v1590_v3 = vld [vmem:[#allocation13 + $0xa8] sm:$0xff] }
 0x482   :  { %3809 = vpow2.f32 %v2649_v4  ;;  %v3649_v4 = vpack.c.bf16 %v1590_v3, %v1589_v2  ;;  %v1866_v3 = vld [vmem:[#allocation12 + $0xe0] sm:$0xff] }
 0x488   :  { %v3808_v5 = vpop.eup %3807 }
 0x489   :  { %v1202_v6 = vadd.f32 1.0, %v3808_v5  ;;  %v1591_v5 = vld [vmem:[#allocation13 + $0xb0] sm:$0xff] }
 0x48b   :  { %3811 = vrcp.f32 %v1202_v6  ;;  %v1592_v6 = vld [vmem:[#allocation13 + $0xb8] sm:$0xff] }
 0x48c   :  { %v3810_v27 = vpop.eup %3809 }
 0x48d   :  { %v1225_v7 = vadd.f32 1.0, %v3810_v27  ;;  %v3652_v27 = vpack.c.bf16 %v1592_v6, %v1591_v5  ;;  %v1891_v6 = vld [vmem:[#allocation13 + $0x120] sm:$0xff] }
 0x48f   :  { %3813 = vrcp.f32 %v1225_v7 }
 0x495   :  { %v3812_v22 = vpop.eup %3811 }
 0x496   :  { %3201 = vmatmul.mubr.msk.f32.vlgmr.msra.gmra.mrb[12].mxu1 %vm170_vm1, %v3812_v22  ;;  %v1675_v22 = vld [vmem:[#allocation12 + $0x80] sm:$0xff] }
 0x497   :  { %3238 = vmatprep.mubr.msk.f32.mxu1 %vm4064_vm0, %v4065_v1  ;;  %3632 = vmatpush3.bf16.msra.mxu1 %v3631_v11  ;;  %v1701_v11 = vld [vmem:[#allocation13 + $0xc8] sm:$0xff] }
 0x498   :  { %3633 = vmatprep.subr.bf16.mxu1 %v4063_v0  ;;  %v3655_v13 = vpack.c.bf16 %v1701_v11, %v1700_v10  ;;  %v1894_v10 = vld [vmem:[#allocation13 + $0x138] sm:$0xff] }
 0x499   :  { %v3814_v8 = vpop.eup %3813 }
 0x49a   :  { %3182 = vmatmul.mubr.msk.f32.vlgmr.msra.gmra.mrb[12].mxu0 %vm170_vm1, %v3814_v8  ;;  %v1676_v8 = vld [vmem:[#allocation12 + $0x88] sm:$0xff] }
 0x49b   :  { %3219 = vmatprep.mubr.msk.f32.mxu0 %vm4064_vm0, %v4065_v1  ;;  %3620 = vmatpush3.bf16.msra.mxu0 %v3619_v14  ;;  %v3667_v9 = vpack.c.bf16 %v1676_v8, %v1675_v22  ;;  %v1678_v14 = vld [vmem:[#allocation12 + $0x98] sm:$0xff] }
 0x49c   :  { %3635 = vmatpush3.bf16.msra.mxu1 %v3634_v17  ;;  %3621 = vmatprep.subr.bf16.mxu0 %v4063_v0  ;;  %v3670_v30 = vpack.c.bf16 %v1678_v14, %v1677_v12  ;;  %v1703_v17 = vld [vmem:[#allocation13 + $0xd8] sm:$0xff] }
 0x49d   :  { %3636 = vmatprep.subr.bf16.mxu1 %v4063_v0  ;;  %v3658_v19 = vpack.c.bf16 %v1703_v17, %v1702_v15  ;;  %v1869_v8 = vld [vmem:[#allocation12 + $0xf8] sm:$0xff] }
 0x49f   :  { %3623 = vmatpush3.bf16.msra.mxu0 %v3622_v20  ;;  %v1680_v20 = vld [vmem:[#allocation12 + $0xa8] sm:$0xff] }
 0x4a0   :  { %3638 = vmatpush3.bf16.msra.mxu1 %v3637_v23  ;;  %3624 = vmatprep.subr.bf16.mxu0 %v4063_v0  ;;  %v3673_v21 = vpack.c.bf16 %v1680_v20, %v1679_v18  ;;  %v1705_v23 = vld [vmem:[#allocation13 + $0xe8] sm:$0xff] }
 0x4a1   :  { %3639 = vmatprep.subr.bf16.mxu1 %v4063_v0  ;;  %v3661_v25 = vpack.c.bf16 %v1705_v23, %v1704_v16 }
 0x4a3   :  { %3626 = vmatpush3.bf16.msra.mxu0 %v3625_v28  ;;  %v3676_v28 = vpack.c.bf16 %v1682_v26, %v1681_v24  ;;  %v2675_v24 = vld [vmem:[%s4583_s11 + $0x5] ss:$0 sm:$0xff] }
 0x4a4   :  { %3641 = vmatpush3.bf16.msra.mxu1 %v3640_v33  ;;  %3627 = vmatprep.subr.bf16.mxu0 %v4063_v0 }
 0x4a5   :  { %3654 = vmatprep.subr.bf16.mxu1 %v4063_v0 }
 0x4a7   :  { %3629 = vmatpush3.bf16.msra.mxu0 %v3628_v34 }
 0x4a8   :  { %3642 = vmatprep.subr.bf16.mxu0 %v4063_v0 }
 0x569   :  { %v1378_v35 = vpop.f32.mrb[12].mxu1 }
 0x56a   :  { %v3202_v36 = vpop.f32.mrb[13].mxu1 }
 0x56d   :  { %v1305_v37 = vpop.f32.mrb[12].mxu0 }
 0x56e   :  { %v1379_v38 = vadd.f32 %v1378_v35, %v1305_v37  ;;  %v3183_v39 = vpop.f32.mrb[13].mxu0 }
 0x570   :  { %v1382_v40 = vadd.f32 %v1379_v38, %v4432_v61 }
 0x572   :  { %v2652_v42 = vmul.f32 -1.442695, %v1382_v40  ;;  %v1398_v43 = vmul.f32 2.0, %v1382_v40 }
 0x574   :  { %3815 = vpow2.f32 %v2652_v42  ;;  %v1407_v44 = vsub.f32 %v1398_v43, %v2654_v41  ;;  %v1577_v47 = vsub.f32 %v1398_v43, %v2659_v46  ;;  %v2664_v42 = vld [vmem:[%s4583_s11 + $0x3] ss:$0 sm:$0xff] }
 0x576   :  { %v2655_v45 = vmul.f32 -1.442695, %v1407_v44  ;;  %v2660_v50 = vmul.f32 -1.442695, %v1577_v47 }
 0x578   :  { %3817 = vpow2.f32 %v2655_v45 }
 0x57e   :  { %v3816_v48 = vpop.eup %3815 }
 0x57f   :  { %v1386_v49 = vadd.f32 1.0, %v3816_v48 }
 0x581   :  { %3819 = vrcp.f32 %v1386_v49 }
 0x582   :  { %v3818_v51 = vpop.eup %3817  ;;  %3821 = vpow2.f32 %v2660_v50 }
 0x583   :  { %v1411_v52 = vadd.f32 1.0, %v3818_v51 }
 0x585   :  { %3823 = vrcp.f32 %v1411_v52  ;;  %v1862_v52 = vld [vmem:[#allocation12 + $0xc0] sm:$0xff] }
 0x586   :  { %v3691_v54 = vpack.c.bf16 %v1863_v53, %v1862_v52  ;;  %v2172_v53 = vld [vmem:[#allocation13 + $0x180] sm:$0xff] }
 0x58b   :  { %v3820_v55 = vpop.eup %3819 }
 0x58c   :  { %3239 = vmatmul.mubr.msk.f32.vlgmr.msra.gmra.mrb[14].mxu1 %vm170_vm1, %v3820_v55  ;;  %v3822_v57 = vpop.eup %3821  ;;  %v1887_v55 = vld [vmem:[#allocation13 + $0x100] sm:$0xff] }
 0x58d   :  { %3276 = vmatprep.mubr.msk.f32.mxu1 %vm4064_vm0, %v4065_v1  ;;  %v1581_v62 = vadd.f32 1.0, %v3822_v57  ;;  %3656 = vmatpush3.bf16.msra.mxu1 %v3655_v13 }
 0x58e   :  { %3657 = vmatprep.subr.bf16.mxu1 %v4063_v0 }
 0x58f   :  { %v3824_v60 = vpop.eup %3823  ;;  %3825 = vrcp.f32 %v1581_v62  ;;  %v1889_v62 = vld [vmem:[#allocation13 + $0x110] sm:$0xff] }
 0x590   :  { %3220 = vmatmul.mubr.msk.f32.vlgmr.msra.gmra.mrb[14].mxu0 %vm170_vm1, %v3824_v60  ;;  %v3694_v60 = vpack.c.bf16 %v1865_v59, %v1864_v58  ;;  %v2174_v59 = vld [vmem:[#allocation13 + $0x190] sm:$0xff] }
 0x591   :  { %3644 = vmatpush3.bf16.msra.mxu0 %v3643_v56  ;;  %3257 = vmatprep.mubr.msk.f32.mxu0 %vm4064_vm0, %v4065_v1  ;;  %v1888_v56 = vld [vmem:[#allocation13 + $0x108] sm:$0xff] }
 0x592   :  { %3645 = vmatprep.subr.bf16.mxu0 %v4063_v0  ;;  %3659 = vmatpush3.bf16.msra.mxu1 %v3658_v19  ;;  %v3679_v57 = vpack.c.bf16 %v1888_v56, %v1887_v55  ;;  %v2670_v19 = vld [vmem:[%s4583_s11 + $0x4] ss:$0 sm:$0xff]  ;;  %v2149_v55 = vld [vmem:[#allocation12 + $0x110] sm:$0xff] }
 0x593   :  { %3660 = vmatprep.subr.bf16.mxu1 %v4063_v0 }
 0x595   :  { %3647 = vmatpush3.bf16.msra.mxu0 %v3646_v63  ;;  %v1890_v63 = vld [vmem:[#allocation13 + $0x118] sm:$0xff] }
 0x596   :  { %3648 = vmatprep.subr.bf16.mxu0 %v4063_v0  ;;  %3662 = vmatpush3.bf16.msra.mxu1 %v3661_v25  ;;  %v3682_v2 = vpack.c.bf16 %v1890_v63, %v1889_v62  ;;  %v2151_v62 = vld [vmem:[#allocation12 + $0x120] sm:$0xff] }
 0x597   :  { %3663 = vmatprep.subr.bf16.mxu1 %v4063_v0 }
 0x599   :  { %3650 = vmatpush3.bf16.msra.mxu0 %v3649_v4  ;;  %v3826_v7 = vpop.eup %3825  ;;  %v1867_v4 = vld [vmem:[#allocation12 + $0xe8] sm:$0xff] }
 0x59a   :  { %3651 = vmatprep.subr.bf16.mxu0 %v4063_v0  ;;  %3665 = vmatpush3.bf16.msra.mxu1 %v3664_v32  ;;  %v3697_v5 = vpack.c.bf16 %v1867_v4, %v1866_v3  ;;  %v2176_v4 = vld [vmem:[#allocation13 + $0x1a0] sm:$0xff] }
 0x59b   :  { %3678 = vmatprep.subr.bf16.mxu1 %v4063_v0 }
 0x59d   :  { %3653 = vmatpush3.bf16.msra.mxu0 %v3652_v27  ;;  %v1892_v27 = vld [vmem:[#allocation13 + $0x128] sm:$0xff] }
 0x59e   :  { %3666 = vmatprep.subr.bf16.mxu0 %v4063_v0  ;;  %v3685_v22 = vpack.c.bf16 %v1892_v27, %v1891_v6  ;;  %v2153_v6 = vld [vmem:[#allocation12 + $0x130] sm:$0xff] }
 0x5a0   :  { %3258 = vmatmul.mubr.msk.f32.vlgmr.msra.gmra.mrb[16].mxu0 %vm170_vm1, %v3826_v7  ;;  %v1868_v7 = vld [vmem:[#allocation12 + $0xf0] sm:$0xff] }
 0x5a1   :  { %3295 = vmatprep.mubr.msk.f32.mxu0 %vm4064_vm0, %v4065_v1  ;;  %3668 = vmatpush3.bf16.msra.mxu0 %v3667_v9  ;;  %v1893_v9 = vld [vmem:[#allocation13 + $0x130] sm:$0xff]  ;;  %v3700_v11 = vpack.c.bf16 %v1869_v8, %v1868_v7  ;;  %v2154_v7 = vld [vmem:[#allocation12 + $0x138] sm:$0xff] }
 0x5a2   :  { %3669 = vmatprep.subr.bf16.mxu0 %v4063_v0  ;;  %v3688_v12 = vpack.c.bf16 %v1894_v10, %v1893_v9  ;;  %v2178_v8 = vld [vmem:[#allocation13 + $0x1b0] sm:$0xff]  ;;  %v2179_v9 = vld [vmem:[#allocation13 + $0x1b8] sm:$0xff] }
 0x5a3   :  { %v3724_v10 = vpack.c.bf16 %v2179_v9, %v2178_v8 }
 0x5a5   :  { %3671 = vmatpush3.bf16.msra.mxu0 %v3670_v30 }
 0x5a6   :  { %3672 = vmatprep.subr.bf16.mxu0 %v4063_v0 }
 0x5a9   :  { %3674 = vmatpush3.bf16.msra.mxu0 %v3673_v21 }
 0x5aa   :  { %3675 = vmatprep.subr.bf16.mxu0 %v4063_v0 }
 0x5ad   :  { %3677 = vmatpush3.bf16.msra.mxu0 %v3676_v28 }
 0x5ae   :  { %3690 = vmatprep.subr.bf16.mxu0 %v4063_v0 }
 0x65f   :  { %v1565_v33 = vpop.f32.mrb[14].mxu1 }
 0x660   :  { %v3240_v34 = vpop.f32.mrb[15].mxu1 }
 0x661   :  { %v2058_v34 = vld [vmem:[#allocation13 + $0x148] sm:$0xff] }
 0x663   :  { %v1492_v35 = vpop.f32.mrb[14].mxu0 }
 0x664   :  { %v1566_v36 = vadd.f32 %v1565_v33, %v1492_v35  ;;  %v3221_v37 = vpop.f32.mrb[15].mxu0  ;;  %v2057_v33 = vld [vmem:[#allocation13 + $0x140] sm:$0xff] }
 0x673   :  { %v1662_v38 = vpop.f32.mrb[16].mxu0 }
 0x674   :  { %v1666_v39 = vadd.f32 %v1662_v38, %v1566_v36  ;;  %v3259_v40 = vpop.f32.mrb[17].mxu0  ;;  %v3703_v36 = vpack.c.bf16 %v2058_v34, %v2057_v33  ;;  %v2059_v38 = vld [vmem:[#allocation13 + $0x150] sm:$0xff]  ;;  %v2335_v33 = vld [vmem:[#allocation12 + $0x148] sm:$0xff] }
 0x676   :  { %v4482_v41 = vadd.f32 %v1666_v39, %v4432_v61  ;;  %v2060_v39 = vld [vmem:[#allocation13 + $0x158] sm:$0xff] }
 0x678   :  { %v2662_v43 = vmul.f32 -1.442695, %v4482_v41  ;;  %v1683_v44 = vmul.f32 2.0, %v4482_v41 }
 0x67a   :  { %3827 = vpow2.f32 %v2662_v43  ;;  %v1692_v45 = vsub.f32 %v1683_v44, %v2664_v42  ;;  %v3706_v43 = vpack.c.bf16 %v2060_v39, %v2059_v38  ;;  %v2061_v44 = vld [vmem:[#allocation13 + $0x160] sm:$0xff]  ;;  %v2336_v38 = vld [vmem:[#allocation12 + $0x150] sm:$0xff]  ;;  %v2337_v39 = vld [vmem:[#allocation12 + $0x158] sm:$0xff] }
 0x67c   :  { %v2665_v46 = vmul.f32 -1.442695, %v1692_v45  ;;  %v2062_v45 = vld [vmem:[#allocation13 + $0x168] sm:$0xff] }
 0x67e   :  { %3829 = vpow2.f32 %v2665_v46  ;;  %v3709_v46 = vpack.c.bf16 %v2062_v45, %v2061_v44  ;;  %v2338_v45 = vld [vmem:[#allocation12 + $0x160] sm:$0xff] }
 0x684   :  { %v3828_v47 = vpop.eup %3827 }
 0x685   :  { %v1671_v48 = vadd.f32 1.0, %v3828_v47  ;;  %v2063_v47 = vld [vmem:[#allocation13 + $0x170] sm:$0xff] }
 0x687   :  { %3831 = vrcp.f32 %v1671_v48  ;;  %v2064_v48 = vld [vmem:[#allocation13 + $0x178] sm:$0xff] }
 0x688   :  { %v3830_v49 = vpop.eup %3829 }
 0x689   :  { %v1696_v50 = vadd.f32 1.0, %v3830_v49  ;;  %v3712_v49 = vpack.c.bf16 %v2064_v48, %v2063_v47  ;;  %v2363_v48 = vld [vmem:[#allocation13 + $0x1e0] sm:$0xff] }
 0x68b   :  { %3833 = vrcp.f32 %v1696_v50 }
 0x691   :  { %v3832_v61 = vpop.eup %3831 }
 0x692   :  { %3296 = vmatmul.mubr.msk.f32.vlgmr.msra.gmra.mrb[18].mxu0 %vm170_vm1, %v3832_v61  ;;  %v2147_v61 = vld [vmem:[#allocation12 + $0x100] sm:$0xff] }
 0x693   :  { %3333 = vmatprep.mubr.msk.f32.mxu0 %vm4064_vm0, %v4065_v1  ;;  %3692 = vmatpush3.bf16.msra.mxu0 %v3691_v54  ;;  %v2173_v54 = vld [vmem:[#allocation13 + $0x188] sm:$0xff] }
 0x694   :  { %3693 = vmatprep.subr.bf16.mxu0 %v4063_v0  ;;  %v3715_v56 = vpack.c.bf16 %v2173_v54, %v2172_v53  ;;  %v2366_v53 = vld [vmem:[#allocation13 + $0x1f8] sm:$0xff] }
 0x695   :  { %v3834_v51 = vpop.eup %3833 }
 0x696   :  { %3277 = vmatmul.mubr.msk.f32.vlgmr.msra.gmra.mrb[16].mxu1 %vm170_vm1, %v3834_v51  ;;  %v2148_v51 = vld [vmem:[#allocation12 + $0x108] sm:$0xff] }
 0x697   :  { %3314 = vmatprep.mubr.msk.f32.mxu1 %vm4064_vm0, %v4065_v1  ;;  %3680 = vmatpush3.bf16.msra.mxu1 %v3679_v57  ;;  %v3727_v52 = vpack.c.bf16 %v2148_v51, %v2147_v61  ;;  %v2150_v57 = vld [vmem:[#allocation12 + $0x118] sm:$0xff] }
 0x698   :  { %3695 = vmatpush3.bf16.msra.mxu0 %v3694_v60  ;;  %3681 = vmatprep.subr.bf16.mxu1 %v4063_v0  ;;  %v3730_v58 = vpack.c.bf16 %v2150_v57, %v2149_v55  ;;  %v2175_v60 = vld [vmem:[#allocation13 + $0x198] sm:$0xff] }
 0x699   :  { %3696 = vmatprep.subr.bf16.mxu0 %v4063_v0  ;;  %v3718_v63 = vpack.c.bf16 %v2175_v60, %v2174_v59  ;;  %v2341_v51 = vld [vmem:[#allocation12 + $0x178] sm:$0xff] }
 0x69b   :  { %3683 = vmatpush3.bf16.msra.mxu1 %v3682_v2  ;;  %v2152_v2 = vld [vmem:[#allocation12 + $0x128] sm:$0xff] }
 0x69c   :  { %3698 = vmatpush3.bf16.msra.mxu0 %v3697_v5  ;;  %3684 = vmatprep.subr.bf16.mxu1 %v4063_v0  ;;  %v3733_v3 = vpack.c.bf16 %v2152_v2, %v2151_v62  ;;  %v2177_v5 = vld [vmem:[#allocation13 + $0x1a8] sm:$0xff] }
 0x69d   :  { %3699 = vmatprep.subr.bf16.mxu0 %v4063_v0  ;;  %v3721_v27 = vpack.c.bf16 %v2177_v5, %v2176_v4 }
 0x69f   :  { %3686 = vmatpush3.bf16.msra.mxu1 %v3685_v22  ;;  %v3736_v22 = vpack.c.bf16 %v2154_v7, %v2153_v6  ;;  %v2691_v6 = vld [vmem:[%s4583_s11 + $0x8] ss:$0 sm:$0xff] }
 0x6a0   :  { %3701 = vmatpush3.bf16.msra.mxu0 %v3700_v11  ;;  %3687 = vmatprep.subr.bf16.mxu1 %v4063_v0 }
 0x6a1   :  { %3714 = vmatprep.subr.bf16.mxu0 %v4063_v0 }
 0x6a3   :  { %3689 = vmatpush3.bf16.msra.mxu1 %v3688_v12 }
 0x6a4   :  { %3702 = vmatprep.subr.bf16.mxu1 %v4063_v0 }
 0x765   :  { %v1850_v13 = vpop.f32.mrb[18].mxu0 }
 0x766   :  { %v3297_v14 = vpop.f32.mrb[19].mxu0 }
 0x769   :  { %v1777_v30 = vpop.f32.mrb[16].mxu1 }
 0x76a   :  { %v1851_v15 = vadd.f32 %v1850_v13, %v1777_v30  ;;  %v3278_v17 = vpop.f32.mrb[17].mxu1 }
 0x76c   :  { %v1854_v18 = vadd.f32 %v1851_v15, %v4482_v41 }
 0x76e   :  { %v2668_v20 = vmul.f32 -1.442695, %v1854_v18  ;;  %v1870_v21 = vmul.f32 2.0, %v1854_v18 }
 0x770   :  { %3835 = vpow2.f32 %v2668_v20  ;;  %v1879_v16 = vsub.f32 %v1870_v21, %v2670_v19  ;;  %v2049_v25 = vsub.f32 %v1870_v21, %v2675_v24  ;;  %v2680_v20 = vld [vmem:[%s4583_s11 + $0x6] ss:$0 sm:$0xff] }
 0x772   :  { %v2671_v23 = vmul.f32 -1.442695, %v1879_v16  ;;  %v2676_v29 = vmul.f32 -1.442695, %v2049_v25 }
 0x774   :  { %3837 = vpow2.f32 %v2671_v23 }
 0x77a   :  { %v3836_v26 = vpop.eup %3835 }
 0x77b   :  { %v1858_v28 = vadd.f32 1.0, %v3836_v26 }
 0x77d   :  { %3839 = vrcp.f32 %v1858_v28 }
 0x77e   :  { %v3838_v31 = vpop.eup %3837  ;;  %3841 = vpow2.f32 %v2676_v29 }
 0x77f   :  { %v1883_v32 = vadd.f32 1.0, %v3838_v31 }
 0x781   :  { %3843 = vrcp.f32 %v1883_v32  ;;  %v2334_v32 = vld [vmem:[#allocation12 + $0x140] sm:$0xff] }
 0x782   :  { %v3751_v34 = vpack.c.bf16 %v2335_v33, %v2334_v32 }
 0x787   :  { %v3840_v35 = vpop.eup %3839 }
 0x788   :  { %3334 = vmatmul.mubr.msk.f32.vlgmr.msra.gmra.mrb[20].mxu0 %vm170_vm1, %v3840_v35  ;;  %v3842_v37 = vpop.eup %3841  ;;  %v2359_v35 = vld [vmem:[#allocation13 + $0x1c0] sm:$0xff] }
 0x789   :  { %3371 = vmatprep.mubr.msk.f32.mxu0 %vm4064_vm0, %v4065_v1  ;;  %v2053_v42 = vadd.f32 1.0, %v3842_v37  ;;  %3716 = vmatpush3.bf16.msra.mxu0 %v3715_v56 }
 0x78a   :  { %3717 = vmatprep.subr.bf16.mxu0 %v4063_v0 }
 0x78b   :  { %v3844_v40 = vpop.eup %3843  ;;  %3845 = vrcp.f32 %v2053_v42  ;;  %v2361_v42 = vld [vmem:[#allocation13 + $0x1d0] sm:$0xff] }
 0x78c   :  { %3315 = vmatmul.mubr.msk.f32.vlgmr.msra.gmra.mrb[18].mxu1 %vm170_vm1, %v3844_v40  ;;  %v3754_v40 = vpack.c.bf16 %v2337_v39, %v2336_v38 }
 0x78d   :  { %3704 = vmatpush3.bf16.msra.mxu1 %v3703_v36  ;;  %3352 = vmatprep.mubr.msk.f32.mxu1 %vm4064_vm0, %v4065_v1  ;;  %v2360_v36 = vld [vmem:[#allocation13 + $0x1c8] sm:$0xff] }
 0x78e   :  { %3705 = vmatprep.subr.bf16.mxu1 %v4063_v0  ;;  %3719 = vmatpush3.bf16.msra.mxu0 %v3718_v63  ;;  %v3739_v37 = vpack.c.bf16 %v2360_v36, %v2359_v35  ;;  %v2686_v63 = vld [vmem:[%s4583_s11 + $0x7] ss:$0 sm:$0xff] }
 0x78f   :  { %3720 = vmatprep.subr.bf16.mxu0 %v4063_v0 }
 0x791   :  { %3707 = vmatpush3.bf16.msra.mxu1 %v3706_v43  ;;  %v2362_v43 = vld [vmem:[#allocation13 + $0x1d8] sm:$0xff] }
 0x792   :  { %3708 = vmatprep.subr.bf16.mxu1 %v4063_v0  ;;  %3722 = vmatpush3.bf16.msra.mxu0 %v3721_v27  ;;  %v3742_v44 = vpack.c.bf16 %v2362_v43, %v2361_v42 }
 0x793   :  { %3723 = vmatprep.subr.bf16.mxu0 %v4063_v0 }
 0x795   :  { %3710 = vmatpush3.bf16.msra.mxu1 %v3709_v46  ;;  %v3846_v50 = vpop.eup %3845  ;;  %v2339_v46 = vld [vmem:[#allocation12 + $0x168] sm:$0xff] }
 0x796   :  { %3711 = vmatprep.subr.bf16.mxu1 %v4063_v0  ;;  %3725 = vmatpush3.bf16.msra.mxu0 %v3724_v10  ;;  %v3757_v47 = vpack.c.bf16 %v2339_v46, %v2338_v45 }
 0x797   :  { %3738 = vmatprep.subr.bf16.mxu0 %v4063_v0 }
 0x799   :  { %3713 = vmatpush3.bf16.msra.mxu1 %v3712_v49  ;;  %v2364_v49 = vld [vmem:[#allocation13 + $0x1e8] sm:$0xff] }
 0x79a   :  { %3726 = vmatprep.subr.bf16.mxu1 %v4063_v0  ;;  %v3745_v61 = vpack.c.bf16 %v2364_v49, %v2363_v48 }
 0x79c   :  { %3353 = vmatmul.mubr.msk.f32.vlgmr.msra.gmra.mrb[20].mxu1 %vm170_vm1, %v3846_v50  ;;  %v2340_v50 = vld [vmem:[#allocation12 + $0x170] sm:$0xff] }
 0x79d   :  { %3390 = vmatprep.mubr.msk.f32.mxu1 %vm4064_vm0, %v4065_v1  ;;  %3728 = vmatpush3.bf16.msra.mxu1 %v3727_v52  ;;  %v2365_v52 = vld [vmem:[#allocation13 + $0x1f0] sm:$0xff]  ;;  %v3760_v54 = vpack.c.bf16 %v2341_v51, %v2340_v50 }
 0x79e   :  { %3729 = vmatprep.subr.bf16.mxu1 %v4063_v0  ;;  %v3748_v55 = vpack.c.bf16 %v2366_v53, %v2365_v52 }
 0x7a1   :  { %3731 = vmatpush3.bf16.msra.mxu1 %v3730_v58 }
 0x7a2   :  { %3732 = vmatprep.subr.bf16.mxu1 %v4063_v0 }
 0x7a5   :  { %3734 = vmatpush3.bf16.msra.mxu1 %v3733_v3 }
 0x7a6   :  { %3735 = vmatprep.subr.bf16.mxu1 %v4063_v0 }
 0x7a9   :  { %3737 = vmatpush3.bf16.msra.mxu1 %v3736_v22 }
 0x7aa   :  { %3750 = vmatprep.subr.bf16.mxu1 %v4063_v0 }
 0x85b   :  { %v2037_v11 = vpop.f32.mrb[20].mxu0 }
 0x85c   :  { %v3335_v12 = vpop.f32.mrb[21].mxu0 }
 0x85d   :  { %v2530_v12 = vld [vmem:[#allocation13 + $0x208] sm:$0xff] }
 0x85f   :  { %v1964_v13 = vpop.f32.mrb[18].mxu1 }
 0x860   :  { %v2038_v14 = vadd.f32 %v2037_v11, %v1964_v13  ;;  %v3316_v30 = vpop.f32.mrb[19].mxu1  ;;  %v2529_v11 = vld [vmem:[#allocation13 + $0x200] sm:$0xff] }
 0x86f   :  { %v2134_v15 = vpop.f32.mrb[20].mxu1 }
 0x870   :  { %v2138_v17 = vadd.f32 %v2134_v15, %v2038_v14  ;;  %v3354_v18 = vpop.f32.mrb[21].mxu1  ;;  %v3763_v14 = vpack.c.bf16 %v2530_v12, %v2529_v11  ;;  %v2531_v15 = vld [vmem:[#allocation13 + $0x210] sm:$0xff] }
 0x872   :  { %v4532_v19 = vadd.f32 %v2138_v17, %v4482_v41  ;;  %v2532_v17 = vld [vmem:[#allocation13 + $0x218] sm:$0xff] }
 0x874   :  { %v2678_v21 = vmul.f32 -1.442695, %v4532_v19  ;;  %v2155_v16 = vmul.f32 2.0, %v4532_v19 }
 0x876   :  { %3847 = vpow2.f32 %v2678_v21  ;;  %v2164_v23 = vsub.f32 %v2155_v16, %v2680_v20  ;;  %v3766_v21 = vpack.c.bf16 %v2532_v17, %v2531_v15  ;;  %v2533_v16 = vld [vmem:[#allocation13 + $0x220] sm:$0xff] }
 0x878   :  { %v2681_v24 = vmul.f32 -1.442695, %v2164_v23  ;;  %v2534_v23 = vld [vmem:[#allocation13 + $0x228] sm:$0xff] }
 0x87a   :  { %3849 = vpow2.f32 %v2681_v24  ;;  %v3769_v24 = vpack.c.bf16 %v2534_v23, %v2533_v16 }
 0x880   :  { %v3848_v25 = vpop.eup %3847 }
 0x881   :  { %v2143_v26 = vadd.f32 1.0, %v3848_v25  ;;  %v2535_v25 = vld [vmem:[#allocation13 + $0x230] sm:$0xff] }
 0x883   :  { %3851 = vrcp.f32 %v2143_v26  ;;  %v2536_v26 = vld [vmem:[#allocation13 + $0x238] sm:$0xff] }
 0x884   :  { %v3850_v28 = vpop.eup %3849 }
 0x885   :  { %v2168_v29 = vadd.f32 1.0, %v3850_v28  ;;  %v3772_v28 = vpack.c.bf16 %v2536_v26, %v2535_v25 }
 0x887   :  { %3853 = vrcp.f32 %v2168_v29 }
 0x88d   :  { %v3852_v41 = vpop.eup %3851 }
 0x88e   :  { %3391 = vmatmul.mubr.msk.f32.vlgmr.msra.gmra.mrb[22].mxu1 %vm170_vm1, %v3852_v41 }
 0x88f   :  { %3428 = vmatprep.mubr.msk.f32.mxu1 %vm4064_vm0, %v4065_v1  ;;  %3752 = vmatpush3.bf16.msra.mxu1 %v3751_v34 }
 0x890   :  { %3753 = vmatprep.subr.bf16.mxu1 %v4063_v0 }
 0x891   :  { %v3854_v31 = vpop.eup %3853 }
 0x892   :  { %3372 = vmatmul.mubr.msk.f32.vlgmr.msra.gmra.mrb[22].mxu0 %vm170_vm1, %v3854_v31 }
 0x893   :  { %3409 = vmatprep.mubr.msk.f32.mxu0 %vm4064_vm0, %v4065_v1  ;;  %3740 = vmatpush3.bf16.msra.mxu0 %v3739_v37 }
 0x894   :  { %3755 = vmatpush3.bf16.msra.mxu1 %v3754_v40  ;;  %3741 = vmatprep.subr.bf16.mxu0 %v4063_v0 }
 0x895   :  { %3756 = vmatprep.subr.bf16.mxu1 %v4063_v0 }
 0x897   :  { %3743 = vmatpush3.bf16.msra.mxu0 %v3742_v44 }
 0x898   :  { %3758 = vmatpush3.bf16.msra.mxu1 %v3757_v47  ;;  %3744 = vmatprep.subr.bf16.mxu0 %v4063_v0 }
 0x899   :  { %3759 = vmatprep.subr.bf16.mxu1 %v4063_v0 }
 0x89b   :  { %3746 = vmatpush3.bf16.msra.mxu0 %v3745_v61 }
 0x89c   :  { %3761 = vmatpush3.bf16.msra.mxu1 %v3760_v54  ;;  %3747 = vmatprep.subr.bf16.mxu0 %v4063_v0 }
 0x89f   :  { %3749 = vmatpush3.bf16.msra.mxu0 %v3748_v55 }
 0x8a0   :  { %3762 = vmatprep.subr.bf16.mxu0 %v4063_v0 }
 0x961   :  { %v2322_v56 = vpop.f32.mrb[22].mxu1 }
 0x962   :  { %v3392_v57 = vpop.f32.mrb[23].mxu1 }
 0x965   :  { %v2249_v58 = vpop.f32.mrb[22].mxu0 }
 0x966   :  { %v2323_v59 = vadd.f32 %v2322_v56, %v2249_v58  ;;  %v3373_v60 = vpop.f32.mrb[23].mxu0 }
 0x968   :  { %v2326_v62 = vadd.f32 %v2323_v59, %v4532_v19 }
 0x96a   :  { %v2684_v2 = vmul.f32 -1.442695, %v2326_v62  ;;  %v2342_v3 = vmul.f32 2.0, %v2326_v62 }
 0x96c   :  { %3855 = vpow2.f32 %v2684_v2  ;;  %v2351_v4 = vsub.f32 %v2342_v3, %v2686_v63  ;;  %v2521_v27 = vsub.f32 %v2342_v3, %v2691_v6 }
 0x96e   :  { %v2687_v5 = vmul.f32 -1.442695, %v2351_v4  ;;  %v2692_v8 = vmul.f32 -1.442695, %v2521_v27 }
 0x970   :  { %3857 = vpow2.f32 %v2687_v5 }
 0x976   :  { %v3856_v7 = vpop.eup %3855 }
 0x977   :  { %v2330_v22 = vadd.f32 1.0, %v3856_v7 }
 0x979   :  { %3859 = vrcp.f32 %v2330_v22 }
 0x97a   :  { %v3858_v9 = vpop.eup %3857  ;;  %3861 = vpow2.f32 %v2692_v8 }
 0x97b   :  { %v2355_v10 = vadd.f32 1.0, %v3858_v9 }
 0x97d   :  { %3863 = vrcp.f32 %v2355_v10 }
 0x983   :  { %v3860_v13 = vpop.eup %3859 }
 0x984   :  { %3429 = vmatmul.mubr.msk.f32.vlgmr.msra.gmra.mrb[24].mxu1 %vm170_vm1, %v3860_v13  ;;  %v3862_v30 = vpop.eup %3861 }
 0x985   :  { %v2525_v20 = vadd.f32 1.0, %v3862_v30 }
 0x987   :  { %v3864_v18 = vpop.eup %3863  ;;  %3865 = vrcp.f32 %v2525_v20 }
 0x988   :  { %3410 = vmatmul.mubr.msk.f32.vlgmr.msra.gmra.mrb[24].mxu0 %vm170_vm1, %v3864_v18 }
 0x989   :  { %3764 = vmatpush3.bf16.msra.mxu0 %v3763_v14  ;;  %3447 = vmatprep.mubr.msk.f32.mxu0 %vm4064_vm0, %v4065_v1 }
 0x98a   :  { %3765 = vmatprep.subr.bf16.mxu0 %v4063_v0 }
 0x98d   :  { %3767 = vmatpush3.bf16.msra.mxu0 %v3766_v21 }
 0x98e   :  { %3768 = vmatprep.subr.bf16.mxu0 %v4063_v0 }
 0x991   :  { %3770 = vmatpush3.bf16.msra.mxu0 %v3769_v24  ;;  %v3866_v29 = vpop.eup %3865 }
 0x992   :  { %3771 = vmatprep.subr.bf16.mxu0 %v4063_v0 }
 0x995   :  { %3773 = vmatpush3.bf16.msra.mxu0 %v3772_v28 }
 0x998   :  { %3448 = vmatmul.mubr.msk.f32.vlgmr.msra.gmra.mrb[26].mxu0 %vm170_vm1, %v3866_v29 }
 0xa57   :  { %v2509_v1 = vpop.f32.mrb[24].mxu1 }
 0xa58   :  { %v3430_v41 = vpop.f32.mrb[25].mxu1 }
 0xa5b   :  { %v2436_v31 = vpop.f32.mrb[24].mxu0 }
 0xa5c   :  { %v2510_v32 = vadd.f32 %v2509_v1, %v2436_v31  ;;  %v3411_v33 = vpop.f32.mrb[25].mxu0 }
 0xa6b   :  { %v2606_v34 = vpop.f32.mrb[26].mxu0 }
 0xa6c   :  { %v2610_v35 = vadd.f32 %v2606_v34, %v2510_v32  ;;  %v3449_v36 = vpop.f32.mrb[27].mxu0 }
 0xa6e   :  { %v2611_v37 = vadd.f32 %v2610_v35, %v4532_v19 }
 0xa70   :  { %2612 = vst.msk [vmem:[%s4585_s13] sm:$0xff] %vm170_vm1, %v2611_v37 }
 0xa71   :  { %2617 = vsyncpa [#allocation3], 1 }
 0xa72   :  { %2618 = vsyncpa [#allocation5], 1 }
 0xa73   :  { %2619 = vsyncpa [#allocation8], 1 }
 0xa74   :  { %2620 = vsyncpa [#allocation11], 1 }
 0xa75   :  { %2621 = vsyncpa [#allocation14], 1 }

</bundles_post_ra>
